<compile_context>
chip_gen: v7x
topology: tpu7x:2x2x1
jax: 0.10.0
libtpu: 0.0.40
codegen_flags: <defaults>
</compile_context>

<pallas_src>
import functools
import math

import jax
import jax.numpy as jnp
import numpy as np
from jax.experimental import pallas as pl
from jax.experimental.pallas import tpu as pltpu

# ----------------------------- config (small) -------------------------------
VOCAB = 100
D_MODEL = 32
N_HEADS = 4
FFN_DIM = 64
N_LAYERS = 2
MAX_POS = 64
PAD_IDX = 1
POS_OFFSET = 2          # extra_pos_embeddings
EMBED_SCALE = 1.0       # scale_embedding=False
LN_EPS = 1e-5

BATCH = 2
SEQ = 8


# ------------------------- shared math ---------------------------------------
def _layer_norm(h, g, b):
    mu = jnp.mean(h, axis=-1, keepdims=True)
    var = jnp.mean((h - mu) ** 2, axis=-1, keepdims=True)
    return (h - mu) * jax.lax.rsqrt(var + LN_EPS) * g + b


def _erf_poly(x):
    """Abramowitz & Stegun 7.1.26 erf approximation (max abs err 1.5e-7)."""
    ax = jnp.abs(x)
    t = 1.0 / (1.0 + 0.3275911 * ax)
    poly = t * (0.254829592 + t * (-0.284496736 + t * (1.421413741
                + t * (-1.453152027 + t * 1.061405429))))
    y = 1.0 - poly * jnp.exp(-ax * ax)
    return jnp.where(x < 0, -y, y)


def _gelu_exact(x):
    return 0.5 * x * (1.0 + _erf_poly(x * (1.0 / math.sqrt(2.0))))


# ------------------------- fused Pallas kernel --------------------------------
def fused_encoder_kernel(num_heads,
                         x_ref, mask_ref, lng_ref, lnb_ref,
                         wqkv_ref, bqkv_ref, wo_ref, bo_ref,
                         ln1g_ref, ln1b_ref,
                         w1_ref, b1_ref, w2_ref, b2_ref,
                         ln2g_ref, ln2b_ref,
                         o_ref, x_scr):
    """One (batch b, layer l) grid step of the BartEncoder forward (post-LN).

    Grid = (B, L), l innermost ("arbitrary"); the hidden state for batch b is
    resident in the VMEM scratch `x_scr` across all l.  Weight refs hold the
    layer-l slice (streamed / double-buffered by the BlockSpec pipeline).
    """
    l = pl.program_id(1)
    num_layers = pl.num_programs(1)

    S, D = x_scr.shape
    H = num_heads
    hd = D // H
    scaling = 1.0 / math.sqrt(hd)

    # layer 0: token+pos embeddings -> layernorm_embedding -> resident state
    @pl.when(l == 0)
    def _():
        x_scr[...] = _layer_norm(x_ref[0], lng_ref[...], lnb_ref[...])

    x = x_scr[...]                       # (S, D)
    m = mask_ref[0]                      # (1, S) additive key-padding mask

    # ---------------- self attention -----------------------------------------
    # single fused full-width QKV projection (MXU-friendly: K=D, N=3D)
    qkv = jnp.dot(x, wqkv_ref[0], preferred_element_type=jnp.float32) + bqkv_ref[0]
    q = qkv[:, 0:D] * scaling
    k = qkv[:, D:2 * D]
    v = qkv[:, 2 * D:3 * D]

    # per-head scores / softmax / context (unrolled; plain 2-D dots, no transposes)
    ctx_heads = []
    for h in range(H):
        qh = q[:, h * hd:(h + 1) * hd]
        kh = k[:, h * hd:(h + 1) * hd]
        vh = v[:, h * hd:(h + 1) * hd]
        s = jax.lax.dot_general(qh, kh, (((1,), (1,)), ((), ())),
                                preferred_element_type=jnp.float32) + m   # (S, S)
        s = s - jnp.max(s, axis=-1, keepdims=True)
        p = jnp.exp(s)
        p = p * pl.reciprocal(jnp.sum(p, axis=-1, keepdims=True), approx=True)
        ctx_heads.append(jnp.dot(p, vh, preferred_element_type=jnp.float32))
    ctx = jnp.concatenate(ctx_heads, axis=-1)                             # (S, D)

    # single full-width output projection, residual, post-LN
    attn = jnp.dot(ctx, wo_ref[0], preferred_element_type=jnp.float32) + bo_ref[0]
    x = _layer_norm(x + attn, ln1g_ref[0], ln1b_ref[0])

    # ---------------- feed forward --------------------------------------------
    hmid = jnp.dot(x, w1_ref[0], preferred_element_type=jnp.float32) + b1_ref[0]
    hmid = _gelu_exact(hmid)
    ff = jnp.dot(hmid, w2_ref[0], preferred_element_type=jnp.float32) + b2_ref[0]
    x = _layer_norm(x + ff, ln2g_ref[0], ln2b_ref[0])
    # TODO(synk): torch inf/nan clamp is a no-op for finite f32 inputs; skipped.

    x_scr[...] = x

    @pl.when(l == num_layers - 1)
    def _():
        o_ref[0] = x


# --------------------------- wrapper ------------------------------------------
def bart_encoder_forward(params, input_ids, attention_mask):
    """Pallas-backed BartEncoder.forward (eval mode). Returns (batch, seq, d_model)."""
    B, S = input_ids.shape
    D, H, L, F = D_MODEL, N_HEADS, N_LAYERS, FFN_DIM

    # glue: embedding gathers (index lookup, not a hot path)
    inputs_embeds = params['embed_tokens'][input_ids] * EMBED_SCALE            # (B,S,D)
    positions = jnp.arange(S, dtype=jnp.int32) + POS_OFFSET
    embed_pos = params['embed_positions'][positions]                           # (S,D)
    x = (inputs_embeds + embed_pos[None]).astype(jnp.float32)                  # (B,S,D)

    # invert_mask: attention_mask==0 -> padded -> additive -inf (-1e30); (B,1,S)
    mask_add = jnp.where(attention_mask == 0, jnp.float32(-1e30),
                         jnp.float32(0.0)).reshape(B, 1, S)

    # host-side weight packing (free): stack layers, fuse wq|wk|wv
    def stack(key):
        return jnp.stack([lp[key] for lp in params['layers']], axis=0)

    wqkv = jnp.concatenate([stack('wq'), stack('wk'), stack('wv')], axis=-1)   # (L,D,3D)
    bqkv = jnp.concatenate([stack('bq'), stack('bk'), stack('bv')], axis=-1)   # (L,1,3D)

    ins = [x, mask_add, params['lne_g'], params['lne_b'],
           wqkv, bqkv, stack('wo'), stack('bo'),
           stack('ln1_g'), stack('ln1_b'),
           stack('w1'), stack('b1'), stack('w2'), stack('b2'),
           stack('ln2_g'), stack('ln2_b')]

    batch_map = lambda b, l: (b, 0, 0)     # per-batch activations / output
    layer_map = lambda b, l: (l, 0, 0)     # per-layer streamed weights
    const_map = lambda b, l: (0, 0)        # layernorm_embedding params

    in_specs = [
        pl.BlockSpec((1, S, D), batch_map),            # x (token+pos embeds)
        pl.BlockSpec((1, 1, S), batch_map),            # additive mask
        pl.BlockSpec((1, D), const_map),               # lne_g
        pl.BlockSpec((1, D), const_map),               # lne_b
        pl.BlockSpec((1, D, 3 * D), layer_map),        # wqkv
        pl.BlockSpec((1, 1, 3 * D), layer_map),        # bqkv
        pl.BlockSpec((1, D, D), layer_map),            # wo
        pl.BlockSpec((1, 1, D), layer_map),            # bo
        pl.BlockSpec((1, 1, D), layer_map),            # ln1_g
        pl.BlockSpec((1, 1, D), layer_map),            # ln1_b
        pl.BlockSpec((1, D, F), layer_map),            # w1
        pl.BlockSpec((1, 1, F), layer_map),            # b1
        pl.BlockSpec((1, F, D), layer_map),            # w2
        pl.BlockSpec((1, 1, D), layer_map),            # b2
        pl.BlockSpec((1, 1, D), layer_map),            # ln2_g
        pl.BlockSpec((1, 1, D), layer_map),            # ln2_b
    ]

    out = pl.pallas_call(
        functools.partial(fused_encoder_kernel, H),
        out_shape=jax.ShapeDtypeStruct((B, S, D), jnp.float32),
        grid_spec=pltpu.PrefetchScalarGridSpec(
            num_scalar_prefetch=0,
            grid=(B, L),                                   # batch parallel, layers inner
            in_specs=in_specs,
            out_specs=pl.BlockSpec((1, S, D), batch_map),
            scratch_shapes=[pltpu.VMEM((S, D), jnp.float32)],   # resident hidden state
        ),
        compiler_params=pltpu.CompilerParams(
            dimension_semantics=("parallel", "arbitrary"),
            vmem_limit_bytes=16 * 1024 * 1024,             # tiny model; plenty of headroom
        ),
    )(*ins)
    return out


# ------------------------ pure-JAX reference ---------------------------------
def reference_forward(params, input_ids, attention_mask):
    B, S = input_ids.shape
    D, H = D_MODEL, N_HEADS
    hd = D // H
    x = params['embed_tokens'][input_ids] * EMBED_SCALE
    pos = params['embed_positions'][jnp.arange(S) + POS_OFFSET]
    x = x + pos[None]
    x = _layer_norm(x, params['lne_g'][0], params['lne_b'][0])
    mask_add = jnp.where(attention_mask == 0, -1e30, 0.0).astype(jnp.float32)

    for p in params['layers']:
        resid = x
        q = (x @ p['wq'] + p['bq'][0]) / math.sqrt(hd)
        k = x @ p['wk'] + p['bk'][0]
        v = x @ p['wv'] + p['bv'][0]
        q = q.reshape(B, S, H, hd).transpose(0, 2, 1, 3)
        k = k.reshape(B, S, H, hd).transpose(0, 2, 1, 3)
        v = v.reshape(B, S, H, hd).transpose(0, 2, 1, 3)
        s = jnp.einsum('bhqd,bhkd->bhqk', q, k) + mask_add[:, None, None, :]
        patt = jax.nn.softmax(s, axis=-1)
        a = jnp.einsum('bhqk,bhkd->bhqd', patt, v).transpose(0, 2, 1, 3).reshape(B, S, D)
        a = a @ p['wo'] + p['bo'][0]
        x = _layer_norm(resid + a, p['ln1_g'][0], p['ln1_b'][0])
        resid = x
        hmid = jax.nn.gelu(x @ p['w1'] + p['b1'][0], approximate=False)
        ff = hmid @ p['w2'] + p['b2'][0]
        x = _layer_norm(resid + ff, p['ln2_g'][0], p['ln2_b'][0])
    return x


# --------------------------- params ------------------------------------------
def make_params(key):
    def nrm(k, shape, scale=0.02):
        return (scale * jax.random.normal(k, shape)).astype(jnp.float32)

    keys = jax.random.split(key, 4 + N_LAYERS)
    embed_tokens = nrm(keys[0], (VOCAB, D_MODEL))
    embed_tokens = embed_tokens.at[PAD_IDX].set(0.0)            # padding_idx row = 0
    embed_positions = nrm(keys[1], (MAX_POS + POS_OFFSET, D_MODEL))
    lne_g = (1.0 + nrm(keys[2], (1, D_MODEL))).astype(jnp.float32)
    lne_b = nrm(keys[3], (1, D_MODEL))

    layers = []
    for li in range(N_LAYERS):
        ks = jax.random.split(keys[4 + li], 18)
        layers.append(dict(
            wq=nrm(ks[0], (D_MODEL, D_MODEL)), bq=nrm(ks[1], (1, D_MODEL)),
            wk=nrm(ks[2], (D_MODEL, D_MODEL)), bk=nrm(ks[3], (1, D_MODEL)),
            wv=nrm(ks[4], (D_MODEL, D_MODEL)), bv=nrm(ks[5], (1, D_MODEL)),
            wo=nrm(ks[6], (D_MODEL, D_MODEL)), bo=nrm(ks[7], (1, D_MODEL)),
            ln1_g=(1.0 + nrm(ks[8], (1, D_MODEL))), ln1_b=nrm(ks[9], (1, D_MODEL)),
            w1=nrm(ks[10], (D_MODEL, FFN_DIM)), b1=nrm(ks[11], (1, FFN_DIM)),
            w2=nrm(ks[12], (FFN_DIM, D_MODEL)), b2=nrm(ks[13], (1, D_MODEL)),
            ln2_g=(1.0 + nrm(ks[14], (1, D_MODEL))), ln2_b=nrm(ks[15], (1, D_MODEL)),
        ))
    return dict(embed_tokens=embed_tokens, embed_positions=embed_positions,
                lne_g=lne_g, lne_b=lne_b, layers=layers)


# ----------------------------- main -------------------------------------------
if __name__ == "__main__":
    key = jax.random.PRNGKey(0)
    pkey, ikey = jax.random.split(key)
    params = make_params(pkey)

    input_ids = jax.random.randint(ikey, (BATCH, SEQ), 2, VOCAB, dtype=jnp.int32)
    attention_mask = jnp.ones((BATCH, SEQ), dtype=jnp.int32)
    attention_mask = attention_mask.at[1, -2:].set(0)           # pad last 2 tokens of batch 1

    out = bart_encoder_forward(params, input_ids, attention_mask)
    out = jax.block_until_ready(out)

    ref = reference_forward(params, input_ids, attention_mask)
    np.testing.assert_allclose(np.asarray(out), np.asarray(ref), rtol=2e-4, atol=2e-4)

    assert out.shape == (BATCH, SEQ, D_MODEL)
    print("KERNEL_OK")
</pallas_src>

<mosaic_0001>
module attributes {stable_mosaic.version = 11 : i64} {
  func.func @fused_encoder_kernel(%arg0: i32, %arg1: i32, %arg2: memref<1x8x32xf32, #tpu.memory_space<vmem>>, %arg3: memref<1x1x8xf32, #tpu.memory_space<vmem>>, %arg4: memref<1x32xf32, #tpu.memory_space<vmem>>, %arg5: memref<1x32xf32, #tpu.memory_space<vmem>>, %arg6: memref<1x32x96xf32, #tpu.memory_space<vmem>>, %arg7: memref<1x1x96xf32, #tpu.memory_space<vmem>>, %arg8: memref<1x32x32xf32, #tpu.memory_space<vmem>>, %arg9: memref<1x1x32xf32, #tpu.memory_space<vmem>>, %arg10: memref<1x1x32xf32, #tpu.memory_space<vmem>>, %arg11: memref<1x1x32xf32, #tpu.memory_space<vmem>>, %arg12: memref<1x32x64xf32, #tpu.memory_space<vmem>>, %arg13: memref<1x1x64xf32, #tpu.memory_space<vmem>>, %arg14: memref<1x64x32xf32, #tpu.memory_space<vmem>>, %arg15: memref<1x1x32xf32, #tpu.memory_space<vmem>>, %arg16: memref<1x1x32xf32, #tpu.memory_space<vmem>>, %arg17: memref<1x1x32xf32, #tpu.memory_space<vmem>>, %arg18: memref<1x8x32xf32, #tpu.memory_space<vmem>>, %arg19: memref<8x32xf32, #tpu.memory_space<vmem>>) attributes {dimension_semantics = [#tpu.dimension_semantics<parallel>, #tpu.dimension_semantics<arbitrary>], iteration_bounds = array<i64: 2, 2>, scalar_prefetch = 0 : i64, scratch_operands = 1 : i64, tpu.core_type = #tpu.core_type<tc>, window_params = [{transform_indices = @transform_0, window_bounds = array<i64: 1, 8, 32>}, {transform_indices = @transform_1, window_bounds = array<i64: 1, 1, 8>}, {pipeline_mode = #tpu.pipeline_mode<synchronous>, transform_indices = @transform_2, window_bounds = array<i64: 1, 32>}, {pipeline_mode = #tpu.pipeline_mode<synchronous>, transform_indices = @transform_3, window_bounds = array<i64: 1, 32>}, {transform_indices = @transform_4, window_bounds = array<i64: 1, 32, 96>}, {transform_indices = @transform_5, window_bounds = array<i64: 1, 1, 96>}, {transform_indices = @transform_6, window_bounds = array<i64: 1, 32, 32>}, {transform_indices = @transform_7, window_bounds = array<i64: 1, 1, 32>}, {transform_indices = @transform_8, window_bounds = array<i64: 1, 1, 32>}, {transform_indices = @transform_9, window_bounds = array<i64: 1, 1, 32>}, {transform_indices = @transform_10, window_bounds = array<i64: 1, 32, 64>}, {transform_indices = @transform_11, window_bounds = array<i64: 1, 1, 64>}, {transform_indices = @transform_12, window_bounds = array<i64: 1, 64, 32>}, {transform_indices = @transform_13, window_bounds = array<i64: 1, 1, 32>}, {transform_indices = @transform_14, window_bounds = array<i64: 1, 1, 32>}, {transform_indices = @transform_15, window_bounds = array<i64: 1, 1, 32>}, {transform_indices = @transform_16, window_bounds = array<i64: 1, 8, 32>}]} {
    %c0_i32 = arith.constant 0 : i32
    %0 = arith.cmpi eq, %arg1, %c0_i32 : i32
    %1 = arith.extui %0 : i1 to i32
    %c0_i32_0 = arith.constant 0 : i32
    %2 = arith.cmpi ne, %1, %c0_i32_0 : i32
    scf.if %2 {
      %c0_89 = arith.constant 0 : index
      %c0_90 = arith.constant 0 : index
      %c0_91 = arith.constant 0 : index
      %206 = vector.load %arg2[%c0_89, %c0_90, %c0_91] : memref<1x8x32xf32, #tpu.memory_space<vmem>>, vector<1x8x32xf32>
      %207 = vector.shape_cast %206 : vector<1x8x32xf32> to vector<8x32xf32>
      %c0_92 = arith.constant 0 : index
      %c0_93 = arith.constant 0 : index
      %208 = vector.load %arg4[%c0_92, %c0_93] : memref<1x32xf32, #tpu.memory_space<vmem>>, vector<1x32xf32>
      %c0_94 = arith.constant 0 : index
      %c0_95 = arith.constant 0 : index
      %209 = vector.load %arg5[%c0_94, %c0_95] : memref<1x32xf32, #tpu.memory_space<vmem>>, vector<1x32xf32>
      %cst_96 = arith.constant dense<0.000000e+00> : vector<8xf32>
      %210 = vector.multi_reduction <add>, %207, %cst_96 [1] : vector<8x32xf32> to vector<8xf32>
      %211 = vector.shape_cast %210 : vector<8xf32> to vector<8x1xf32>
      %cst_97 = arith.constant 3.200000e+01 : f32
      %212 = vector.broadcast %cst_97 : f32 to vector<8x1xf32>
      %213 = arith.divf %211, %212 : vector<8x1xf32>
      %214 = vector.broadcast %213 : vector<8x1xf32> to vector<8x32xf32>
      %215 = arith.subf %207, %214 : vector<8x32xf32>
      %216 = arith.mulf %215, %215 : vector<8x32xf32>
      %cst_98 = arith.constant dense<0.000000e+00> : vector<8xf32>
      %217 = vector.multi_reduction <add>, %216, %cst_98 [1] : vector<8x32xf32> to vector<8xf32>
      %218 = vector.shape_cast %217 : vector<8xf32> to vector<8x1xf32>
      %cst_99 = arith.constant 3.200000e+01 : f32
      %219 = vector.broadcast %cst_99 : f32 to vector<8x1xf32>
      %220 = arith.divf %218, %219 : vector<8x1xf32>
      %221 = vector.broadcast %213 : vector<8x1xf32> to vector<8x32xf32>
      %222 = arith.subf %207, %221 : vector<8x32xf32>
      %cst_100 = arith.constant 9.99999974E-6 : f32
      %223 = vector.broadcast %cst_100 : f32 to vector<8x1xf32>
      %224 = arith.addf %220, %223 : vector<8x1xf32>
      %225 = math.rsqrt %224 : vector<8x1xf32>
      %226 = vector.broadcast %225 : vector<8x1xf32> to vector<8x32xf32>
      %227 = arith.mulf %222, %226 : vector<8x32xf32>
      %228 = vector.broadcast %208 : vector<1x32xf32> to vector<8x32xf32>
      %229 = arith.mulf %227, %228 : vector<8x32xf32>
      %230 = vector.broadcast %209 : vector<1x32xf32> to vector<8x32xf32>
      %231 = arith.addf %229, %230 : vector<8x32xf32>
      %c0_101 = arith.constant 0 : index
      %c0_102 = arith.constant 0 : index
      %232 = vector.load %arg19[%c0_101, %c0_102] : memref<8x32xf32, #tpu.memory_space<vmem>>, vector<8x32xf32>
      tpu.vector_store %arg19[%c0_101, %c0_102], %231 {strides = array<i32>} : memref<8x32xf32, #tpu.memory_space<vmem>>, vector<8x32xf32>,
    } else {
    }
    %c0 = arith.constant 0 : index
    %c0_1 = arith.constant 0 : index
    %3 = vector.load %arg19[%c0, %c0_1] : memref<8x32xf32, #tpu.memory_space<vmem>>, vector<8x32xf32>
    %c0_2 = arith.constant 0 : index
    %c0_3 = arith.constant 0 : index
    %c0_4 = arith.constant 0 : index
    %4 = vector.load %arg3[%c0_2, %c0_3, %c0_4] : memref<1x1x8xf32, #tpu.memory_space<vmem>>, vector<1x1x8xf32>
    %5 = vector.shape_cast %4 : vector<1x1x8xf32> to vector<1x8xf32>
    %c0_5 = arith.constant 0 : index
    %c0_6 = arith.constant 0 : index
    %c0_7 = arith.constant 0 : index
    %6 = vector.load %arg6[%c0_5, %c0_6, %c0_7] : memref<1x32x96xf32, #tpu.memory_space<vmem>>, vector<1x32x96xf32>
    %7 = vector.shape_cast %6 : vector<1x32x96xf32> to vector<32x96xf32>
    %cst = arith.constant dense<0.000000e+00> : vector<8x96xf32>
    %8 = tpu.matmul %3, %7, %cst {dimension_numbers = #tpu.dot_dimension_numbers<[1], [0], [0], [1], [0, 0, 1, 1], [], []>} : vector<8x32xf32>, vector<32x96xf32>, vector<8x96xf32> -> vector<8x96xf32>
    %c0_8 = arith.constant 0 : index
    %c0_9 = arith.constant 0 : index
    %c0_10 = arith.constant 0 : index
    %9 = vector.load %arg7[%c0_8, %c0_9, %c0_10] : memref<1x1x96xf32, #tpu.memory_space<vmem>>, vector<1x1x96xf32>
    %10 = vector.shape_cast %9 : vector<1x1x96xf32> to vector<1x96xf32>
    %11 = vector.broadcast %10 : vector<1x96xf32> to vector<8x96xf32>
    %12 = arith.addf %8, %11 : vector<8x96xf32>
    %13 = vector.extract_strided_slice %12 {offsets = [0, 0], sizes = [8, 32], strides = [1, 1]} : vector<8x96xf32> to vector<8x32xf32>
    %cst_11 = arith.constant 0.353553385 : f32
    %14 = vector.broadcast %cst_11 : f32 to vector<8x32xf32>
    %15 = arith.mulf %13, %14 : vector<8x32xf32>
    %16 = vector.extract_strided_slice %12 {offsets = [0, 32], sizes = [8, 32], strides = [1, 1]} : vector<8x96xf32> to vector<8x32xf32>
    %17 = vector.extract_strided_slice %12 {offsets = [0, 64], sizes = [8, 32], strides = [1, 1]} : vector<8x96xf32> to vector<8x32xf32>
    %18 = vector.extract_strided_slice %15 {offsets = [0, 0], sizes = [8, 8], strides = [1, 1]} : vector<8x32xf32> to vector<8x8xf32>
    %19 = vector.extract_strided_slice %16 {offsets = [0, 0], sizes = [8, 8], strides = [1, 1]} : vector<8x32xf32> to vector<8x8xf32>
    %20 = vector.extract_strided_slice %17 {offsets = [0, 0], sizes = [8, 8], strides = [1, 1]} : vector<8x32xf32> to vector<8x8xf32>
    %cst_12 = arith.constant dense<0.000000e+00> : vector<8x8xf32>
    %21 = tpu.matmul %18, %19, %cst_12 {dimension_numbers = #tpu.dot_dimension_numbers<[1], [1], [0], [0], [0, 0, 1, 0], [], []>} : vector<8x8xf32>, vector<8x8xf32>, vector<8x8xf32> -> vector<8x8xf32>
    %22 = vector.broadcast %5 : vector<1x8xf32> to vector<8x8xf32>
    %23 = arith.addf %21, %22 : vector<8x8xf32>
    %cst_13 = arith.constant dense<0xFF800000> : vector<8xf32>
    %24 = vector.multi_reduction <maximumf>, %23, %cst_13 [1] : vector<8x8xf32> to vector<8xf32>
    %25 = vector.shape_cast %24 : vector<8xf32> to vector<8x1xf32>
    %26 = vector.broadcast %25 : vector<8x1xf32> to vector<8x8xf32>
    %27 = arith.subf %23, %26 : vector<8x8xf32>
    %28 = math.exp %27 : vector<8x8xf32>
    %cst_14 = arith.constant dense<0.000000e+00> : vector<8xf32>
    %29 = vector.multi_reduction <add>, %28, %cst_14 [1] : vector<8x8xf32> to vector<8xf32>
    %30 = vector.shape_cast %29 : vector<8xf32> to vector<8x1xf32>
    %31 = tpu.reciprocal %30 {approx = true} : vector<8x1xf32> -> vector<8x1xf32>
    %32 = vector.broadcast %31 : vector<8x1xf32> to vector<8x8xf32>
    %33 = arith.mulf %28, %32 : vector<8x8xf32>
    %cst_15 = arith.constant dense<0.000000e+00> : vector<8x8xf32>
    %34 = tpu.matmul %33, %20, %cst_15 {dimension_numbers = #tpu.dot_dimension_numbers<[1], [0], [0], [1], [0, 0, 1, 1], [], []>} : vector<8x8xf32>, vector<8x8xf32>, vector<8x8xf32> -> vector<8x8xf32>
    %35 = vector.extract_strided_slice %15 {offsets = [0, 8], sizes = [8, 8], strides = [1, 1]} : vector<8x32xf32> to vector<8x8xf32>
    %36 = vector.extract_strided_slice %16 {offsets = [0, 8], sizes = [8, 8], strides = [1, 1]} : vector<8x32xf32> to vector<8x8xf32>
    %37 = vector.extract_strided_slice %17 {offsets = [0, 8], sizes = [8, 8], strides = [1, 1]} : vector<8x32xf32> to vector<8x8xf32>
    %cst_16 = arith.constant dense<0.000000e+00> : vector<8x8xf32>
    %38 = tpu.matmul %35, %36, %cst_16 {dimension_numbers = #tpu.dot_dimension_numbers<[1], [1], [0], [0], [0, 0, 1, 0], [], []>} : vector<8x8xf32>, vector<8x8xf32>, vector<8x8xf32> -> vector<8x8xf32>
    %39 = vector.broadcast %5 : vector<1x8xf32> to vector<8x8xf32>
    %40 = arith.addf %38, %39 : vector<8x8xf32>
    %cst_17 = arith.constant dense<0xFF800000> : vector<8xf32>
    %41 = vector.multi_reduction <maximumf>, %40, %cst_17 [1] : vector<8x8xf32> to vector<8xf32>
    %42 = vector.shape_cast %41 : vector<8xf32> to vector<8x1xf32>
    %43 = vector.broadcast %42 : vector<8x1xf32> to vector<8x8xf32>
    %44 = arith.subf %40, %43 : vector<8x8xf32>
    %45 = math.exp %44 : vector<8x8xf32>
    %cst_18 = arith.constant dense<0.000000e+00> : vector<8xf32>
    %46 = vector.multi_reduction <add>, %45, %cst_18 [1] : vector<8x8xf32> to vector<8xf32>
    %47 = vector.shape_cast %46 : vector<8xf32> to vector<8x1xf32>
    %48 = tpu.reciprocal %47 {approx = true} : vector<8x1xf32> -> vector<8x1xf32>
    %49 = vector.broadcast %48 : vector<8x1xf32> to vector<8x8xf32>
    %50 = arith.mulf %45, %49 : vector<8x8xf32>
    %cst_19 = arith.constant dense<0.000000e+00> : vector<8x8xf32>
    %51 = tpu.matmul %50, %37, %cst_19 {dimension_numbers = #tpu.dot_dimension_numbers<[1], [0], [0], [1], [0, 0, 1, 1], [], []>} : vector<8x8xf32>, vector<8x8xf32>, vector<8x8xf32> -> vector<8x8xf32>
    %52 = vector.extract_strided_slice %15 {offsets = [0, 16], sizes = [8, 8], strides = [1, 1]} : vector<8x32xf32> to vector<8x8xf32>
    %53 = vector.extract_strided_slice %16 {offsets = [0, 16], sizes = [8, 8], strides = [1, 1]} : vector<8x32xf32> to vector<8x8xf32>
    %54 = vector.extract_strided_slice %17 {offsets = [0, 16], sizes = [8, 8], strides = [1, 1]} : vector<8x32xf32> to vector<8x8xf32>
    %cst_20 = arith.constant dense<0.000000e+00> : vector<8x8xf32>
    %55 = tpu.matmul %52, %53, %cst_20 {dimension_numbers = #tpu.dot_dimension_numbers<[1], [1], [0], [0], [0, 0, 1, 0], [], []>} : vector<8x8xf32>, vector<8x8xf32>, vector<8x8xf32> -> vector<8x8xf32>
    %56 = vector.broadcast %5 : vector<1x8xf32> to vector<8x8xf32>
    %57 = arith.addf %55, %56 : vector<8x8xf32>
    %cst_21 = arith.constant dense<0xFF800000> : vector<8xf32>
    %58 = vector.multi_reduction <maximumf>, %57, %cst_21 [1] : vector<8x8xf32> to vector<8xf32>
    %59 = vector.shape_cast %58 : vector<8xf32> to vector<8x1xf32>
    %60 = vector.broadcast %59 : vector<8x1xf32> to vector<8x8xf32>
    %61 = arith.subf %57, %60 : vector<8x8xf32>
    %62 = math.exp %61 : vector<8x8xf32>
    %cst_22 = arith.constant dense<0.000000e+00> : vector<8xf32>
    %63 = vector.multi_reduction <add>, %62, %cst_22 [1] : vector<8x8xf32> to vector<8xf32>
    %64 = vector.shape_cast %63 : vector<8xf32> to vector<8x1xf32>
    %65 = tpu.reciprocal %64 {approx = true} : vector<8x1xf32> -> vector<8x1xf32>
    %66 = vector.broadcast %65 : vector<8x1xf32> to vector<8x8xf32>
    %67 = arith.mulf %62, %66 : vector<8x8xf32>
    %cst_23 = arith.constant dense<0.000000e+00> : vector<8x8xf32>
    %68 = tpu.matmul %67, %54, %cst_23 {dimension_numbers = #tpu.dot_dimension_numbers<[1], [0], [0], [1], [0, 0, 1, 1], [], []>} : vector<8x8xf32>, vector<8x8xf32>, vector<8x8xf32> -> vector<8x8xf32>
    %69 = vector.extract_strided_slice %15 {offsets = [0, 24], sizes = [8, 8], strides = [1, 1]} : vector<8x32xf32> to vector<8x8xf32>
    %70 = vector.extract_strided_slice %16 {offsets = [0, 24], sizes = [8, 8], strides = [1, 1]} : vector<8x32xf32> to vector<8x8xf32>
    %71 = vector.extract_strided_slice %17 {offsets = [0, 24], sizes = [8, 8], strides = [1, 1]} : vector<8x32xf32> to vector<8x8xf32>
    %cst_24 = arith.constant dense<0.000000e+00> : vector<8x8xf32>
    %72 = tpu.matmul %69, %70, %cst_24 {dimension_numbers = #tpu.dot_dimension_numbers<[1], [1], [0], [0], [0, 0, 1, 0], [], []>} : vector<8x8xf32>, vector<8x8xf32>, vector<8x8xf32> -> vector<8x8xf32>
    %73 = vector.broadcast %5 : vector<1x8xf32> to vector<8x8xf32>
    %74 = arith.addf %72, %73 : vector<8x8xf32>
    %cst_25 = arith.constant dense<0xFF800000> : vector<8xf32>
    %75 = vector.multi_reduction <maximumf>, %74, %cst_25 [1] : vector<8x8xf32> to vector<8xf32>
    %76 = vector.shape_cast %75 : vector<8xf32> to vector<8x1xf32>
    %77 = vector.broadcast %76 : vector<8x1xf32> to vector<8x8xf32>
    %78 = arith.subf %74, %77 : vector<8x8xf32>
    %79 = math.exp %78 : vector<8x8xf32>
    %cst_26 = arith.constant dense<0.000000e+00> : vector<8xf32>
    %80 = vector.multi_reduction <add>, %79, %cst_26 [1] : vector<8x8xf32> to vector<8xf32>
    %81 = vector.shape_cast %80 : vector<8xf32> to vector<8x1xf32>
    %82 = tpu.reciprocal %81 {approx = true} : vector<8x1xf32> -> vector<8x1xf32>
    %83 = vector.broadcast %82 : vector<8x1xf32> to vector<8x8xf32>
    %84 = arith.mulf %79, %83 : vector<8x8xf32>
    %cst_27 = arith.constant dense<0.000000e+00> : vector<8x8xf32>
    %85 = tpu.matmul %84, %71, %cst_27 {dimension_numbers = #tpu.dot_dimension_numbers<[1], [0], [0], [1], [0, 0, 1, 1], [], []>} : vector<8x8xf32>, vector<8x8xf32>, vector<8x8xf32> -> vector<8x8xf32>
    %86 = tpu.concatenate %34, %51, %68, %85 in 1 : vector<8x8xf32>, vector<8x8xf32>, vector<8x8xf32>, vector<8x8xf32> -> vector<8x32xf32>
    %c0_28 = arith.constant 0 : index
    %c0_29 = arith.constant 0 : index
    %c0_30 = arith.constant 0 : index
    %87 = vector.load %arg8[%c0_28, %c0_29, %c0_30] : memref<1x32x32xf32, #tpu.memory_space<vmem>>, vector<1x32x32xf32>
    %88 = vector.shape_cast %87 : vector<1x32x32xf32> to vector<32x32xf32>
    %cst_31 = arith.constant dense<0.000000e+00> : vector<8x32xf32>
    %89 = tpu.matmul %86, %88, %cst_31 {dimension_numbers = #tpu.dot_dimension_numbers<[1], [0], [0], [1], [0, 0, 1, 1], [], []>} : vector<8x32xf32>, vector<32x32xf32>, vector<8x32xf32> -> vector<8x32xf32>
    %c0_32 = arith.constant 0 : index
    %c0_33 = arith.constant 0 : index
    %c0_34 = arith.constant 0 : index
    %90 = vector.load %arg9[%c0_32, %c0_33, %c0_34] : memref<1x1x32xf32, #tpu.memory_space<vmem>>, vector<1x1x32xf32>
    %91 = vector.shape_cast %90 : vector<1x1x32xf32> to vector<1x32xf32>
    %92 = vector.broadcast %91 : vector<1x32xf32> to vector<8x32xf32>
    %93 = arith.addf %89, %92 : vector<8x32xf32>
    %94 = arith.addf %3, %93 : vector<8x32xf32>
    %c0_35 = arith.constant 0 : index
    %c0_36 = arith.constant 0 : index
    %c0_37 = arith.constant 0 : index
    %95 = vector.load %arg10[%c0_35, %c0_36, %c0_37] : memref<1x1x32xf32, #tpu.memory_space<vmem>>, vector<1x1x32xf32>
    %96 = vector.shape_cast %95 : vector<1x1x32xf32> to vector<1x32xf32>
    %c0_38 = arith.constant 0 : index
    %c0_39 = arith.constant 0 : index
    %c0_40 = arith.constant 0 : index
    %97 = vector.load %arg11[%c0_38, %c0_39, %c0_40] : memref<1x1x32xf32, #tpu.memory_space<vmem>>, vector<1x1x32xf32>
    %98 = vector.shape_cast %97 : vector<1x1x32xf32> to vector<1x32xf32>
    %cst_41 = arith.constant dense<0.000000e+00> : vector<8xf32>
    %99 = vector.multi_reduction <add>, %94, %cst_41 [1] : vector<8x32xf32> to vector<8xf32>
    %100 = vector.shape_cast %99 : vector<8xf32> to vector<8x1xf32>
    %cst_42 = arith.constant 3.200000e+01 : f32
    %101 = vector.broadcast %cst_42 : f32 to vector<8x1xf32>
    %102 = arith.divf %100, %101 : vector<8x1xf32>
    %103 = vector.broadcast %102 : vector<8x1xf32> to vector<8x32xf32>
    %104 = arith.subf %94, %103 : vector<8x32xf32>
    %105 = arith.mulf %104, %104 : vector<8x32xf32>
    %cst_43 = arith.constant dense<0.000000e+00> : vector<8xf32>
    %106 = vector.multi_reduction <add>, %105, %cst_43 [1] : vector<8x32xf32> to vector<8xf32>
    %107 = vector.shape_cast %106 : vector<8xf32> to vector<8x1xf32>
    %cst_44 = arith.constant 3.200000e+01 : f32
    %108 = vector.broadcast %cst_44 : f32 to vector<8x1xf32>
    %109 = arith.divf %107, %108 : vector<8x1xf32>
    %110 = vector.broadcast %102 : vector<8x1xf32> to vector<8x32xf32>
    %111 = arith.subf %94, %110 : vector<8x32xf32>
    %cst_45 = arith.constant 9.99999974E-6 : f32
    %112 = vector.broadcast %cst_45 : f32 to vector<8x1xf32>
    %113 = arith.addf %109, %112 : vector<8x1xf32>
    %114 = math.rsqrt %113 : vector<8x1xf32>
    %115 = vector.broadcast %114 : vector<8x1xf32> to vector<8x32xf32>
    %116 = arith.mulf %111, %115 : vector<8x32xf32>
    %117 = vector.broadcast %96 : vector<1x32xf32> to vector<8x32xf32>
    %118 = arith.mulf %116, %117 : vector<8x32xf32>
    %119 = vector.broadcast %98 : vector<1x32xf32> to vector<8x32xf32>
    %120 = arith.addf %118, %119 : vector<8x32xf32>
    %c0_46 = arith.constant 0 : index
    %c0_47 = arith.constant 0 : index
    %c0_48 = arith.constant 0 : index
    %121 = vector.load %arg12[%c0_46, %c0_47, %c0_48] : memref<1x32x64xf32, #tpu.memory_space<vmem>>, vector<1x32x64xf32>
    %122 = vector.shape_cast %121 : vector<1x32x64xf32> to vector<32x64xf32>
    %cst_49 = arith.constant dense<0.000000e+00> : vector<8x64xf32>
    %123 = tpu.matmul %120, %122, %cst_49 {dimension_numbers = #tpu.dot_dimension_numbers<[1], [0], [0], [1], [0, 0, 1, 1], [], []>} : vector<8x32xf32>, vector<32x64xf32>, vector<8x64xf32> -> vector<8x64xf32>
    %c0_50 = arith.constant 0 : index
    %c0_51 = arith.constant 0 : index
    %c0_52 = arith.constant 0 : index
    %124 = vector.load %arg13[%c0_50, %c0_51, %c0_52] : memref<1x1x64xf32, #tpu.memory_space<vmem>>, vector<1x1x64xf32>
    %125 = vector.shape_cast %124 : vector<1x1x64xf32> to vector<1x64xf32>
    %126 = vector.broadcast %125 : vector<1x64xf32> to vector<8x64xf32>
    %127 = arith.addf %123, %126 : vector<8x64xf32>
    %cst_53 = arith.constant 5.000000e-01 : f32
    %128 = vector.broadcast %cst_53 : f32 to vector<8x64xf32>
    %129 = arith.mulf %128, %127 : vector<8x64xf32>
    %cst_54 = arith.constant 0.707106769 : f32
    %130 = vector.broadcast %cst_54 : f32 to vector<8x64xf32>
    %131 = arith.mulf %127, %130 : vector<8x64xf32>
    %132 = math.absf %131 : vector<8x64xf32>
    %cst_55 = arith.constant 0.327591091 : f32
    %133 = vector.broadcast %cst_55 : f32 to vector<8x64xf32>
    %134 = arith.mulf %133, %132 : vector<8x64xf32>
    %cst_56 = arith.constant 1.000000e+00 : f32
    %135 = vector.broadcast %cst_56 : f32 to vector<8x64xf32>
    %136 = arith.addf %135, %134 : vector<8x64xf32>
    %cst_57 = arith.constant 1.000000e+00 : f32
    %137 = vector.broadcast %cst_57 : f32 to vector<8x64xf32>
    %138 = arith.divf %137, %136 : vector<8x64xf32>
    %cst_58 = arith.constant 1.06140542 : f32
    %139 = vector.broadcast %cst_58 : f32 to vector<8x64xf32>
    %140 = arith.mulf %138, %139 : vector<8x64xf32>
    %cst_59 = arith.constant -1.45315206 : f32
    %141 = vector.broadcast %cst_59 : f32 to vector<8x64xf32>
    %142 = arith.addf %141, %140 : vector<8x64xf32>
    %143 = arith.mulf %138, %142 : vector<8x64xf32>
    %cst_60 = arith.constant 1.42141378 : f32
    %144 = vector.broadcast %cst_60 : f32 to vector<8x64xf32>
    %145 = arith.addf %144, %143 : vector<8x64xf32>
    %146 = arith.mulf %138, %145 : vector<8x64xf32>
    %cst_61 = arith.constant -0.284496725 : f32
    %147 = vector.broadcast %cst_61 : f32 to vector<8x64xf32>
    %148 = arith.addf %147, %146 : vector<8x64xf32>
    %149 = arith.mulf %138, %148 : vector<8x64xf32>
    %cst_62 = arith.constant 0.254829586 : f32
    %150 = vector.broadcast %cst_62 : f32 to vector<8x64xf32>
    %151 = arith.addf %150, %149 : vector<8x64xf32>
    %152 = arith.mulf %138, %151 : vector<8x64xf32>
    %cst_63 = arith.constant 0.000000e+00 : f32
    %153 = vector.broadcast %cst_63 : f32 to vector<8x64xf32>
    %154 = arith.subf %153, %132 : vector<8x64xf32>
    %155 = arith.mulf %154, %132 : vector<8x64xf32>
    %156 = math.exp %155 : vector<8x64xf32>
    %157 = arith.mulf %152, %156 : vector<8x64xf32>
    %cst_64 = arith.constant 1.000000e+00 : f32
    %158 = vector.broadcast %cst_64 : f32 to vector<8x64xf32>
    %159 = arith.subf %158, %157 : vector<8x64xf32>
    %cst_65 = arith.constant 0.000000e+00 : f32
    %160 = vector.broadcast %cst_65 : f32 to vector<8x64xf32>
    %161 = arith.cmpf olt, %131, %160 : vector<8x64xf32>
    %cst_66 = arith.constant 0.000000e+00 : f32
    %162 = vector.broadcast %cst_66 : f32 to vector<8x64xf32>
    %163 = arith.subf %162, %159 : vector<8x64xf32>
    %164 = arith.select %161, %163, %159 : vector<8x64xi1>, vector<8x64xf32>
    %cst_67 = arith.constant 1.000000e+00 : f32
    %165 = vector.broadcast %cst_67 : f32 to vector<8x64xf32>
    %166 = arith.addf %165, %164 : vector<8x64xf32>
    %167 = arith.mulf %129, %166 : vector<8x64xf32>
    %c0_68 = arith.constant 0 : index
    %c0_69 = arith.constant 0 : index
    %c0_70 = arith.constant 0 : index
    %168 = vector.load %arg14[%c0_68, %c0_69, %c0_70] : memref<1x64x32xf32, #tpu.memory_space<vmem>>, vector<1x64x32xf32>
    %169 = vector.shape_cast %168 : vector<1x64x32xf32> to vector<64x32xf32>
    %cst_71 = arith.constant dense<0.000000e+00> : vector<8x32xf32>
    %170 = tpu.matmul %167, %169, %cst_71 {dimension_numbers = #tpu.dot_dimension_numbers<[1], [0], [0], [1], [0, 0, 1, 1], [], []>} : vector<8x64xf32>, vector<64x32xf32>, vector<8x32xf32> -> vector<8x32xf32>
    %c0_72 = arith.constant 0 : index
    %c0_73 = arith.constant 0 : index
    %c0_74 = arith.constant 0 : index
    %171 = vector.load %arg15[%c0_72, %c0_73, %c0_74] : memref<1x1x32xf32, #tpu.memory_space<vmem>>, vector<1x1x32xf32>
    %172 = vector.shape_cast %171 : vector<1x1x32xf32> to vector<1x32xf32>
    %173 = vector.broadcast %172 : vector<1x32xf32> to vector<8x32xf32>
    %174 = arith.addf %170, %173 : vector<8x32xf32>
    %175 = arith.addf %120, %174 : vector<8x32xf32>
    %c0_75 = arith.constant 0 : index
    %c0_76 = arith.constant 0 : index
    %c0_77 = arith.constant 0 : index
    %176 = vector.load %arg16[%c0_75, %c0_76, %c0_77] : memref<1x1x32xf32, #tpu.memory_space<vmem>>, vector<1x1x32xf32>
    %177 = vector.shape_cast %176 : vector<1x1x32xf32> to vector<1x32xf32>
    %c0_78 = arith.constant 0 : index
    %c0_79 = arith.constant 0 : index
    %c0_80 = arith.constant 0 : index
    %178 = vector.load %arg17[%c0_78, %c0_79, %c0_80] : memref<1x1x32xf32, #tpu.memory_space<vmem>>, vector<1x1x32xf32>
    %179 = vector.shape_cast %178 : vector<1x1x32xf32> to vector<1x32xf32>
    %cst_81 = arith.constant dense<0.000000e+00> : vector<8xf32>
    %180 = vector.multi_reduction <add>, %175, %cst_81 [1] : vector<8x32xf32> to vector<8xf32>
    %181 = vector.shape_cast %180 : vector<8xf32> to vector<8x1xf32>
    %cst_82 = arith.constant 3.200000e+01 : f32
    %182 = vector.broadcast %cst_82 : f32 to vector<8x1xf32>
    %183 = arith.divf %181, %182 : vector<8x1xf32>
    %184 = vector.broadcast %183 : vector<8x1xf32> to vector<8x32xf32>
    %185 = arith.subf %175, %184 : vector<8x32xf32>
    %186 = arith.mulf %185, %185 : vector<8x32xf32>
    %cst_83 = arith.constant dense<0.000000e+00> : vector<8xf32>
    %187 = vector.multi_reduction <add>, %186, %cst_83 [1] : vector<8x32xf32> to vector<8xf32>
    %188 = vector.shape_cast %187 : vector<8xf32> to vector<8x1xf32>
    %cst_84 = arith.constant 3.200000e+01 : f32
    %189 = vector.broadcast %cst_84 : f32 to vector<8x1xf32>
    %190 = arith.divf %188, %189 : vector<8x1xf32>
    %191 = vector.broadcast %183 : vector<8x1xf32> to vector<8x32xf32>
    %192 = arith.subf %175, %191 : vector<8x32xf32>
    %cst_85 = arith.constant 9.99999974E-6 : f32
    %193 = vector.broadcast %cst_85 : f32 to vector<8x1xf32>
    %194 = arith.addf %190, %193 : vector<8x1xf32>
    %195 = math.rsqrt %194 : vector<8x1xf32>
    %196 = vector.broadcast %195 : vector<8x1xf32> to vector<8x32xf32>
    %197 = arith.mulf %192, %196 : vector<8x32xf32>
    %198 = vector.broadcast %177 : vector<1x32xf32> to vector<8x32xf32>
    %199 = arith.mulf %197, %198 : vector<8x32xf32>
    %200 = vector.broadcast %179 : vector<1x32xf32> to vector<8x32xf32>
    %201 = arith.addf %199, %200 : vector<8x32xf32>
    %c0_86 = arith.constant 0 : index
    %c0_87 = arith.constant 0 : index
    %202 = vector.load %arg19[%c0_86, %c0_87] : memref<8x32xf32, #tpu.memory_space<vmem>>, vector<8x32xf32>
    tpu.vector_store %arg19[%c0_86, %c0_87], %201 {strides = array<i32>} : memref<8x32xf32, #tpu.memory_space<vmem>>, vector<8x32xf32>,
    %c1_i32 = arith.constant 1 : i32
    %203 = arith.cmpi eq, %arg1, %c1_i32 : i32
    %204 = arith.extui %203 : i1 to i32
    %c0_i32_88 = arith.constant 0 : i32
    %205 = arith.cmpi ne, %204, %c0_i32_88 : i32
    scf.if %205 {
      %c0_89 = arith.constant 0 : index
      %c0_90 = arith.constant 0 : index
      %c0_91 = arith.constant 0 : index
      %206 = vector.load %arg18[%c0_89, %c0_90, %c0_91] : memref<1x8x32xf32, #tpu.memory_space<vmem>>, vector<1x8x32xf32>
      %207 = vector.shape_cast %206 : vector<1x8x32xf32> to vector<8x32xf32>
      %208 = vector.shape_cast %201 : vector<8x32xf32> to vector<1x8x32xf32>
      tpu.vector_store %arg18[%c0_89, %c0_90, %c0_91], %208 {strides = array<i32>} : memref<1x8x32xf32, #tpu.memory_space<vmem>>, vector<1x8x32xf32>,
    } else {
    }
    return
  }
  func.func @transform_0(%arg0: i32, %arg1: i32) -> (i32, i32, i32) {
    %c0_i32 = arith.constant 0 : i32
    %c0_i32_0 = arith.constant 0 : i32
    %c0_i32_1 = arith.constant 0 : i32
    return %arg0, %c0_i32, %c0_i32_0 : i32, i32, i32
  }
  func.func @transform_1(%arg0: i32, %arg1: i32) -> (i32, i32, i32) {
    %c0_i32 = arith.constant 0 : i32
    %c0_i32_0 = arith.constant 0 : i32
    %c0_i32_1 = arith.constant 0 : i32
    return %arg0, %c0_i32, %c0_i32_0 : i32, i32, i32
  }
  func.func @transform_2(%arg0: i32, %arg1: i32) -> (i32, i32) {
    %c0_i32 = arith.constant 0 : i32
    %c0_i32_0 = arith.constant 0 : i32
    %c0_i32_1 = arith.constant 0 : i32
    return %c0_i32, %c0_i32_0 : i32, i32
  }
  func.func @transform_3(%arg0: i32, %arg1: i32) -> (i32, i32) {
    %c0_i32 = arith.constant 0 : i32
    %c0_i32_0 = arith.constant 0 : i32
    %c0_i32_1 = arith.constant 0 : i32
    return %c0_i32, %c0_i32_0 : i32, i32
  }
  func.func @transform_4(%arg0: i32, %arg1: i32) -> (i32, i32, i32) {
    %c0_i32 = arith.constant 0 : i32
    %c0_i32_0 = arith.constant 0 : i32
    %c0_i32_1 = arith.constant 0 : i32
    return %arg1, %c0_i32, %c0_i32_0 : i32, i32, i32
  }
  func.func @transform_5(%arg0: i32, %arg1: i32) -> (i32, i32, i32) {
    %c0_i32 = arith.constant 0 : i32
    %c0_i32_0 = arith.constant 0 : i32
    %c0_i32_1 = arith.constant 0 : i32
    return %arg1, %c0_i32, %c0_i32_0 : i32, i32, i32
  }
  func.func @transform_6(%arg0: i32, %arg1: i32) -> (i32, i32, i32) {
    %c0_i32 = arith.constant 0 : i32
    %c0_i32_0 = arith.constant 0 : i32
    %c0_i32_1 = arith.constant 0 : i32
    return %arg1, %c0_i32, %c0_i32_0 : i32, i32, i32
  }
  func.func @transform_7(%arg0: i32, %arg1: i32) -> (i32, i32, i32) {
    %c0_i32 = arith.constant 0 : i32
    %c0_i32_0 = arith.constant 0 : i32
    %c0_i32_1 = arith.constant 0 : i32
    return %arg1, %c0_i32, %c0_i32_0 : i32, i32, i32
  }
  func.func @transform_8(%arg0: i32, %arg1: i32) -> (i32, i32, i32) {
    %c0_i32 = arith.constant 0 : i32
    %c0_i32_0 = arith.constant 0 : i32
    %c0_i32_1 = arith.constant 0 : i32
    return %arg1, %c0_i32, %c0_i32_0 : i32, i32, i32
  }
  func.func @transform_9(%arg0: i32, %arg1: i32) -> (i32, i32, i32) {
    %c0_i32 = arith.constant 0 : i32
    %c0_i32_0 = arith.constant 0 : i32
    %c0_i32_1 = arith.constant 0 : i32
    return %arg1, %c0_i32, %c0_i32_0 : i32, i32, i32
  }
  func.func @transform_10(%arg0: i32, %arg1: i32) -> (i32, i32, i32) {
    %c0_i32 = arith.constant 0 : i32
    %c0_i32_0 = arith.constant 0 : i32
    %c0_i32_1 = arith.constant 0 : i32
    return %arg1, %c0_i32, %c0_i32_0 : i32, i32, i32
  }
  func.func @transform_11(%arg0: i32, %arg1: i32) -> (i32, i32, i32) {
    %c0_i32 = arith.constant 0 : i32
    %c0_i32_0 = arith.constant 0 : i32
    %c0_i32_1 = arith.constant 0 : i32
    return %arg1, %c0_i32, %c0_i32_0 : i32, i32, i32
  }
  func.func @transform_12(%arg0: i32, %arg1: i32) -> (i32, i32, i32) {
    %c0_i32 = arith.constant 0 : i32
    %c0_i32_0 = arith.constant 0 : i32
    %c0_i32_1 = arith.constant 0 : i32
    return %arg1, %c0_i32, %c0_i32_0 : i32, i32, i32
  }
  func.func @transform_13(%arg0: i32, %arg1: i32) -> (i32, i32, i32) {
    %c0_i32 = arith.constant 0 : i32
    %c0_i32_0 = arith.constant 0 : i32
    %c0_i32_1 = arith.constant 0 : i32
    return %arg1, %c0_i32, %c0_i32_0 : i32, i32, i32
  }
  func.func @transform_14(%arg0: i32, %arg1: i32) -> (i32, i32, i32) {
    %c0_i32 = arith.constant 0 : i32
    %c0_i32_0 = arith.constant 0 : i32
    %c0_i32_1 = arith.constant 0 : i32
    return %arg1, %c0_i32, %c0_i32_0 : i32, i32, i32
  }
  func.func @transform_15(%arg0: i32, %arg1: i32) -> (i32, i32, i32) {
    %c0_i32 = arith.constant 0 : i32
    %c0_i32_0 = arith.constant 0 : i32
    %c0_i32_1 = arith.constant 0 : i32
    return %arg1, %c0_i32, %c0_i32_0 : i32, i32, i32
  }
  func.func @transform_16(%arg0: i32, %arg1: i32) -> (i32, i32, i32) {
    %c0_i32 = arith.constant 0 : i32
    %c0_i32_0 = arith.constant 0 : i32
    %c0_i32_1 = arith.constant 0 : i32
    return %arg0, %c0_i32, %c0_i32_0 : i32, i32, i32
  }
}

</mosaic_0001>

<bundles_post_ra>
// kernel: tpu_custom_call.1
= control target key start
LH: loop header
LB: loop body
LE: loop exit
PB: predicated region body
PF: predicated region fallthrough
CT: control target
= control target key end

     0   :  { %s3328_s0 = inlined_call_operand.hbm [shape: f32[2,8,32], index: 0, kind: input, shape index: {}]   ;;  %s3329_s1 = inlined_call_operand.vmem [shape: f32[2,1,8], index: 1, kind: input, shape index: {}]   ;;  %s3330_s2 = inlined_call_operand.hbm [shape: f32[1,32], index: 2, kind: input, shape index: {}]   ;;  %s3331_s3 = inlined_call_operand.hbm [shape: f32[1,32], index: 3, kind: input, shape index: {}]   ;;  %s3332_s4 = inlined_call_operand.vmem [shape: f32[2,32,96], index: 4, kind: input, shape index: {}]   ;;  %s3333_s5 = inlined_call_operand.vmem [shape: f32[2,1,96], index: 5, kind: input, shape index: {}]   ;;  %s3334_s6 = inlined_call_operand.vmem [shape: f32[2,32,32], index: 6, kind: input, shape index: {}]   ;;  %s3335_s7 = inlined_call_operand.vmem [shape: f32[2,1,32], index: 7, kind: input, shape index: {}]   ;;  %s3336_s8 = inlined_call_operand.vmem [shape: f32[2,1,32], index: 8, kind: input, shape index: {}]   ;;  %s3337_s9 = inlined_call_operand.vmem [shape: f32[2,1,32], index: 9, kind: input, shape index: {}]   ;;  %s3338_s10 = inlined_call_operand.vmem [shape: f32[2,32,64], index: 10, kind: input, shape index: {}]   ;;  %s3339_s11 = inlined_call_operand.vmem [shape: f32[2,1,64], index: 11, kind: input, shape index: {}]   ;;  %s3340_s12 = inlined_call_operand.vmem [shape: f32[2,64,32], index: 12, kind: input, shape index: {}]   ;;  %s3341_s13 = inlined_call_operand.vmem [shape: f32[2,1,32], index: 13, kind: input, shape index: {}]   ;;  %s3342_s14 = inlined_call_operand.vmem [shape: f32[2,1,32], index: 14, kind: input, shape index: {}]   ;;  %s3343_s15 = inlined_call_operand.vmem [shape: f32[2,1,32], index: 15, kind: input, shape index: {}]   ;;  %s3344_s16 = inlined_call_operand.hbm [shape: f32[2,8,32], index: 16, kind: output, shape index: {}]  }
   0x1   :  { %3365 = sst [smem:[#allocation26_spill]] %s3328_s0 }
   0x2   :  { %3366 = sst [smem:[#allocation27_spill]] %s3330_s2 }
   0x3   :  { %3367 = sst [smem:[#allocation28_spill]] %s3331_s3 }
   0x4   :  { %3368 = sst [smem:[#allocation29_spill]] %s3332_s4 }
   0x5   :  { %3369 = sst [smem:[#allocation30_spill]] %s3334_s6 }
   0x6   :  { %3370 = sst [smem:[#allocation31_spill]] %s3335_s7 }
   0x7   :  { %3371 = sst [smem:[#allocation32_spill]] %s3336_s8 }
   0x8   :  { %3372 = sst [smem:[#allocation33_spill]] %s3337_s9 }
   0x9   :  { %3373 = sst [smem:[#allocation34_spill]] %s3338_s10 }
   0xa   :  { %3374 = sst [smem:[#allocation35_spill]] %s3339_s11 }
   0xb   :  { %3375 = sst [smem:[#allocation36_spill]] %s3340_s12 }
   0xc   :  { %3376 = sst [smem:[#allocation37_spill]] %s3341_s13 }
   0xd   :  { %3377 = sst [smem:[#allocation38_spill]] %s3342_s14 }
   0xe   :  { %3378 = sst [smem:[#allocation39_spill]] %s3343_s15 }
   0xf   :  { %3379 = sst [smem:[#allocation40_spill]] %s3344_s16 }
  0x10   :  { %21 = vsyncpa [#allocation4], 0 }
  0x11   :  { %23 = vsyncpa [#allocation4 + $0x1], 0 }
  0x12   :  { %24 = vsyncpa [#allocation7], 0 }
  0x13   :  { %25 = vsyncpa [#allocation5], 0 }
  0x14   :  { %27 = vsyncpa [#allocation5 + $0x1], 0  ;;  %s2841_s21 = smov 0   ;;  %s2843_s22 = smov 0  }
  0x15   :  { %s2845_s23 = smov 0   ;;  %s2847_s24 = smov 0  }
  0x16   :  { %s2849_s25 = smov 0   ;;  %s2851_s26 = smov 0  }
  0x17   :  { %s2853_s27 = smov 0   ;;  %s2855_s28 = smov 0  }
  0x18 LB: > { %3380 = sst [smem:[#allocation13_spill]] %s2705_s21  ;;  %s2183_s29 = sadd.s32 4294967295, %s2733_s28   ;;  %s2733_s28 = sphi %s2855_s28, %s33_s28   ;;  %s2729_s27 = sphi %s2853_s27, %s3446_s27   ;;  %s2725_s26 = sphi %s2851_s26, %s3445_s26   ;;  %s2721_s25 = sphi %s2849_s25, %s3444_s25   ;;  %s2717_s24 = sphi %s2847_s24, %s3443_s24   ;;  %s2713_s23 = sphi %s2845_s23, %s3442_s23   ;;  %s2709_s22 = sphi %s2843_s22, %s3441_s22   ;;  %s2705_s21 = sphi %s2841_s21, %s3440_s21  }
  0x19   : > { %3381 = sst [smem:[#allocation14_spill]] %s2709_s22  ;;  %s2184_s30 = sadd.s32 4294967294, %s2733_s28  }
  0x1a   : > { %3382 = sst [smem:[#allocation15_spill]] %s2713_s23  ;;  %p65_p0 = scmp.ne.s32.totalorder %s2709_s22, %s2705_s21 }
  0x1b   : > { %3383 = sst [smem:[#allocation16_spill]] %s2721_s25  ;;  %p2885_p1 = scmp.eq.s32.totalorder %s2183_s29, 0 }
  0x1c   : > { %3384 = sst [smem:[#allocation17_spill]] %s2725_s26  ;;  %p2889_p2 = scmp.eq.s32.totalorder %s2183_s29, 3 }
  0x1d   : > { %3385 = sst [smem:[#allocation18_spill]] %s2729_s27  ;;  %p475_p3 = scmp.eq.s32.totalorder %s2184_s30, 3 }
  0x1e   : > { %3386 = sst [smem:[#allocation19_spill]] %s2733_s28  ;;  %p2895_p4 = por %p2885_p1, %p65_p0 }
  0x1f   : > { %s3387_s0 = scalar_select %p2885_p1, 1, 0 }
  0x20   : > { %s3388_s17 = scalar_select %p2889_p2, 1, 0 }
  0x21   : > { %s3389_s18 = scalar_select %p2895_p4, 1, 0 }
  0x22   : > { %p2185_p5 = scmp.ge.s32.totalorder %s2733_s28, 1  ;;  %p2900_p6 = por %p475_p3, %p65_p0 }
  0x23   : > { %p482_p7 = scmp.lt.s32.totalorder %s2733_s28, 5  ;;  %s2735_s29 = smov [#allocation6]  }
  0x24   : > { %s3390_s19 = scalar_select %p2900_p6, 1, 0 }
  0x25   : > { %p2905_p8 = pnand %p2185_p5, %p482_p7  ;;  %s495_s21 = sshll.u32 %s2735_s29, 4  ;;  %s496_s21 = int_to_ptr.vmem [resolvable:$true] %s495_s21 }
  0x26   : > { %3391 = sst [smem:[#allocation20_spill]] %s3390_s19  ;;  %s2736_s30 = smov [#allocation8]  }
  0x27   : > { %s3392_s20 = scalar_select %p2905_p8, 1, 0 }
  0x28   : > { %p2415_p9 = pneg %p2905_p8  ;;  %s506_s16 = sshll.u32 %s2736_s30, 4  ;;  %s2917_s16 = int_to_ptr.vmem [resolvable:$true] %s506_s16 }
  0x29   : > { %s3394_s2 = sld [smem:[#allocation27_spill]] }
  0x2a   : > { %p2913_p10 = pnand %p2415_p9, %p2885_p1 }
  0x2c   : > { %p2547_p12 = pneg %p2913_p10 }
  0x2f   : > { %s2545_s13 = scalar_lea.hbm %s3394_s2, 16 }
  0x30   : > { %p2546_p11 = scmp.ne.s32.totalorder %s3394_s2, %s2545_s13  ;;  %p2552_p3 = scmp.lt.u32.totalorder %s2545_s13, %s3394_s2 }
  0x32   : > { %p2548_p13 = pnand %p2547_p12, %p2546_p11 }
  0x34   : > { %p2549_p0 = pneg %p2548_p13 }
  0x36   : > { %p2554_p5 = pnand %p2552_p3, %p2549_p0 }
  0x38   : > { %2557 = shalt.err (!%p2554_p5)
}
  0x39   : > { %s2558_s10 = scalar_lea.vmem %s496_s21, 16  ;;  %s2565_s12 = scalar_lea.vmem %s496_s21, 32 }
  0x3a   : > { %p2559_p7 = scmp.ne.s32.totalorder %s496_s21, %s2558_s10  ;;  %p2566_p1 = scmp.lt.s32.totalorder %s496_s21, %s496_s21 }
  0x3b   : > { %p2567_p4 = scmp.lt.s32.totalorder %s2565_s12, %s2558_s10 }
  0x3c   : > { %p2561_p9 = pnand %p2559_p7, %p2547_p12 }
  0x3d   : > { %p2568_p8 = por %p2567_p4, %p2566_p1 }
  0x3e   : > { %p2562_p6 = pneg %p2561_p9 }
  0x40   : > { %p2569_p2 = pnand %p2568_p8, %p2562_p6 }
  0x42   : > { %2572 = shalt.err (!%p2569_p2)
}
  0x43   : > { %2418 = dma.hbm_to_vmem [thread:$0]  (!%p2913_p10), %s3394_s2, 16, %s496_s21, [#allocation7]  }
  0x44   : > { %s3395_s3 = sld [smem:[#allocation28_spill]] }
  0x4a   : > { %s2573_s29 = scalar_lea.hbm %s3395_s3, 16 }
  0x4b   : > { %p2574_p11 = scmp.ne.s32.totalorder %s3395_s3, %s2573_s29  ;;  %p2580_p2 = scmp.lt.u32.totalorder %s2573_s29, %s3395_s3 }
  0x4d   : > { %p2576_p1 = pnand %p2574_p11, %p2547_p12 }
  0x4f   : > { %p2577_p4 = pneg %p2576_p1 }
  0x51   : > { %p2582_p6 = pnand %p2580_p2, %p2577_p4 }
  0x53   : > { %2585 = shalt.err (!%p2582_p6)
}
  0x54   : > { %s2586_s21 = scalar_lea.vmem %s2917_s16, 16  ;;  %s2593_s9 = scalar_lea.vmem %s2917_s16, 32 }
  0x55   : > { %p2587_p8 = scmp.ne.s32.totalorder %s2917_s16, %s2586_s21  ;;  %p2594_p3 = scmp.lt.s32.totalorder %s2917_s16, %s2917_s16 }
  0x56   : > { %p2595_p5 = scmp.lt.s32.totalorder %s2593_s9, %s2586_s21 }
  0x57   : > { %p2589_p13 = pnand %p2587_p8, %p2547_p12 }
  0x58   : > { %p2596_p7 = por %p2595_p5, %p2594_p3 }
  0x59   : > { %p2590_p0 = pneg %p2589_p13 }
  0x5b   : > { %p2597_p9 = pnand %p2596_p7, %p2590_p0 }
  0x5d   : > { %2600 = shalt.err (!%p2597_p9)
}
  0x5e   : > { %2421 = dma.hbm_to_vmem [thread:$0]  (!%p2913_p10), %s3395_s3, 16, %s2917_s16, [#allocation7]  }
  0x5f   : > { %s42_s13 = sadd.s32 1, %s2725_s26  ;;  %s45_s19 = sadd.s32 1, %s2729_s27 }
  0x60   : > { %p43_p12 = scmp.ge.s32.totalorder %s42_s13, 2  ;;  %s52_s15 = sadd.s32 1, %s2713_s23 }
  0x61   : > { %p59_p11 = scmp.ne.s32.totalorder %s2713_s23, %s2709_s22  ;;  %p60_p1 = scmp.eq.s32.totalorder %s2733_s28, 0 }
  0x62   : > { %s3448_s13 = smov (%p43_p12, %s42_s13), 0  ;;  %s3450_s19 = smov (!%p43_p12, %s45_s19), %s2729_s27 }
  0x63   : > { %3396 = sst [smem:[#allocation21_spill]] %s3448_s13  ;;  %p2976_p4 = por %p60_p1, %p59_p11 }
  0x64   : > { %p3398_p2 = scmp.ne.s32.totalorder %s3388_s17, 0  ;;  %p47_p10 = scmp.ge.s32.totalorder %s3450_s19, 2 }
  0x65   : > { %p2432_p8 = scmp.lt.s32.totalorder %s2733_s28, 4  ;;  %s517_s16 = sand.u32 1, %s2713_s23  }
  0x66   : > { %p2982_p6 = por %p3398_p2, %p59_p11  ;;  %s2190_s10 = sshll.u32 %s2729_s27, 7 }
  0x67   : > { %s3452_s19 = smov (%p47_p10, %s3450_s19), 0  ;;  %s2189_s12 = sshll.u32 %s517_s16, 3 }
  0x68   : > { %s3399_s30 = scalar_select %p2982_p6, 1, 0 }
  0x69   : > { %3401 = sst [smem:[#allocation23_spill]] %s3452_s19  ;;  %s49_s21 = ssub.s32 %s2729_s27, %s3452_s19 }
  0x6a   : > { %3400 = sst [smem:[#allocation22_spill]] %s3399_s30  ;;  %p50_p13 = scmp.eq.s32.totalorder %s49_s21, 0 }
  0x6b   : > { %s3402_s11 = sld [smem:[#allocation26_spill]]  ;;  %s521_s17 = scalar_lea.vmem [#allocation3], %s2189_s12 }
  0x6c   : > { %s528_s3 = sshll.u32 %s521_s17, 4  ;;  %p3000_p0 = pnand %p2432_p8, %p2976_p4  ;;  %s3007_s3 = int_to_ptr.vmem [resolvable:$true] %s528_s3 }
  0x6d   : > { %s3005_s19 = scalar_select %p50_p13, %s2713_s23, %s52_s15  }
  0x6e   : > { %s518_s21 = scalar_lea.sflag [#allocation4], %s517_s16  ;;  %p2603_p5 = pneg %p3000_p0 }
  0x6f   : > { %3404 = sst [smem:[#allocation24_spill]] %s3005_s19 }
  0x71   : > { %s2996_s2 = scalar_lea.hbm %s3402_s11, %s2190_s10  ;;  %s2606_s9 = scalar_lea.hbm %s3402_s11, 256 }
  0x72   : > { %s2601_s10 = scalar_lea.hbm %s2996_s2, 128  ;;  %p2607_p12 = scmp.lt.u32.totalorder %s2996_s2, %s3402_s11 }
  0x73   : > { %p2602_p3 = scmp.ne.s32.totalorder %s2996_s2, %s2601_s10  ;;  %p2608_p11 = scmp.lt.u32.totalorder %s2606_s9, %s2601_s10 }
  0x74   : > { %p2610_p4 = scmp.lt.u32.totalorder %s2601_s10, %s2996_s2 }
  0x75   : > { %p2604_p7 = pnand %p2603_p5, %p2602_p3  ;;  %p2609_p1 = por %p2608_p11, %p2607_p12 }
  0x77   : > { %p2605_p9 = pneg %p2604_p7  ;;  %p2611_p2 = por %p2610_p4, %p2609_p1 }
  0x79   : > { %p2612_p10 = pnand %p2611_p2, %p2605_p9 }
  0x7b   : > { %2615 = shalt.err (!%p2612_p10)
}
  0x7c   : > { %s2616_s15 = scalar_lea.vmem %s3007_s3, 128  ;;  %s2737_s16 = smov [#allocation3]  }
  0x7d   : > { %p2617_p8 = scmp.ne.s32.totalorder %s3007_s3, %s2616_s15  ;;  %s2621_s29 = sshll.u32 %s2737_s16, 4  ;;  %s2622_s29 = int_to_ptr.vmem [resolvable:$false] %s2621_s29 }
  0x7e   : > { %s2623_s12 = scalar_lea.vmem %s2622_s29, 256  ;;  %p2624_p7 = scmp.lt.s32.totalorder %s3007_s3, %s2622_s29 }
  0x7f   : > { %p2619_p13 = pnand %p2617_p8, %p2603_p5  ;;  %p2625_p12 = scmp.lt.s32.totalorder %s2623_s12, %s2616_s15 }
  0x81   : > { %p2620_p3 = pneg %p2619_p13  ;;  %p2626_p11 = por %p2625_p12, %p2624_p7 }
  0x83   : > { %p2627_p1 = pnand %p2626_p11, %p2620_p3 }
  0x85   : > { %2630 = shalt.err (!%p2627_p1)
}
  0x86   : > { %2425 = dma.hbm_to_vmem [thread:$0]  (!%p3000_p0), %s2996_s2, 128, %s3007_s3, %s518_s21  }
  0x87   : > { %p3405_p9 = scmp.ne.s32.totalorder %s3392_s20, 0 }
  0x89   : > { %623 = sbr.rel (%p3405_p9) target bundleno = 3077 (0xc05), region = 84 }
  0x90   : > { %s3037_s10 = sand.u32 1, %s2709_s22   ;;  %p3407_p5 = scmp.ne.s32.totalorder %s3389_s18, 0 }
  0x91   : > { %3406 = sst [smem:[#allocation25_spill]] %s3037_s10  ;;  %s2192_s9 = sshll.u32 %s3037_s10, 3 }
  0x92   : > { %s626_s14 = scalar_lea.sflag [#allocation4], %s3037_s10  ;;  %s629_s17 = scalar_lea.vmem [#allocation3], %s2192_s9 }
  0x93   : > { %2692 = dma.done.wait (%p3407_p5), %s626_s14, 128  }
  0x94   : > { %2694 = vsyncadd (%p3407_p5), %s626_s14, 4294967168  ;;  %p3408_p4 = scmp.ne.s32.totalorder %s3387_s0, 0 }
  0x96   : > { %2696 = dma.done.wait (%p3408_p4), [#allocation7], 32  }
  0x97   : > { %2698 = vsyncadd (%p3408_p4), [#allocation7], 4294967264  ;;  %p733_p0 = scmp.lt.s32.totalorder %s2721_s25, 1  ;;  %p736_p2 = scmp.lt.s32.totalorder %s2717_s24, 1 }
  0x98   : > { %s3409_s4 = sld [smem:[#allocation29_spill]]  ;;  %s3410_s6 = sld [smem:[#allocation30_spill]] }
  0x99   : > { %s3052_s2 = scalar_select %p733_p0, %s2721_s25, 1 }
  0x9a   : > { %s3055_s3 = scalar_select %p736_p2, %s2717_s24, 1 }
  0x9b   : > { %s3416_s19 = sld [smem:[#allocation36_spill]]  ;;  %s3417_s22 = sld [smem:[#allocation37_spill]] }
  0x9c   : > { %s2237_s13 = sshll.u32 %s3055_s3, 5  ;;  %s2240_s25 = sshll.u32 %s3055_s3, 6 }
  0x9d   : > { %s3418_s28 = sld [smem:[#allocation38_spill]]  ;;  %s3419_s12 = sld [smem:[#allocation39_spill]] }
  0x9e   : > { %s3069_s14 = scalar_lea.vmem %s3409_s4, %s2237_s13  ;;  %s3074_s11 = scalar_lea.vmem %s3410_s6, %s2237_s13 }
  0x9f   : > { %s3414_s4 = sld [smem:[#allocation34_spill]]  ;;  %s3415_s6 = sld [smem:[#allocation35_spill]] }
  0xa0   : > { %s3115_s20 = scalar_lea.vmem [#allocation9], %s2192_s9  ;;  %p2204_p10 = scmp.ne.s32.totalorder %s2717_s24, 0 }
  0xa1   : > { %s3101_s7 = scalar_lea.vmem %s3416_s19, %s2240_s25  ;;  %s773_s21 = scalar_lea.vmem %s3417_s22, %s3055_s3  ;;  %v784_v0 = vld [vmem:[%s629_s17] sm:$0xff] (!%p2204_p10)  ;;  %vm787_vm0 = vcmask (!%p2204_p10), 261120   ;;  %v2205_v11 = vld [vmem:[#allocation6] ss:$0 sm:$0xff] (!%p2204_p10)  ;;  %v2206_v13 = vld [vmem:[#allocation8] ss:$0 sm:$0xff] (!%p2204_p10) }
  0xa2   : > { %783 = sbr.rel (%p2204_p10) target bundleno = 476 (0x1dc), region = 100  ;;  %v788_v1 = vsel (!%p2204_p10), %vm787_vm0, %v784_v0, 0.0 }
  0xa3   : > { %s776_s29 = scalar_lea.vmem %s3418_s28, %s3055_s3  ;;  %s779_s8 = scalar_lea.vmem %s3419_s12, %s3055_s3  ;;  %789 = vadd.xlane.f32.xlu0 (!%p2204_p10), %v788_v1 }
  0xa5   : > { %s3091_s30 = scalar_lea.vmem %s3414_s4, %s2237_s13  ;;  %s765_s10 = scalar_lea.vmem %s3415_s6, %s3055_s3 }
 0x130   : > { %v790_v2 = vpop.xlane.xlu0 %789 }
 0x131   : > { %v792_v3 = vmul.f32 0.03125, %v790_v2 }
 0x133   : > { %v793_v4 = vsub.f32 %v784_v0, %v792_v3 }
 0x135   : > { %v794_v5 = vmul.f32 %v793_v4, %v793_v4 }
 0x137   : > { %v795_v6 = vsel %vm787_vm0, %v794_v5, 0.0 }
 0x138   : > { %796 = vadd.xlane.f32.xlu0 %v795_v6 }
 0x1c5   : > { %v797_v7 = vpop.xlane.xlu0 %796 }
 0x1c6   : > { %v798_v8 = vmul.f32 0.03125, %v797_v7 }
 0x1c8   : > { %v799_v9 = vadd.f32 1e-05, %v798_v8 }
 0x1ca   : > { %2519 = vrsqrt.f32 %v799_v9 }
 0x1d4   : > { %v2520_v10 = vpop.eup %2519 }
 0x1d5   : > { %v801_v12 = vmul.f32 %v2520_v10, %v793_v4 }
 0x1d7   : > { %v808_v14 = vmul.f32 %v2205_v11, %v801_v12 }
 0x1d9   : > { %v815_v15 = vadd.f32 %v2206_v13, %v808_v14 }
 0x1db   : > { %816 = vst.msk [vmem:[#allocation2] sm:$0xff] %vm787_vm0, %v815_v15 }
 0x1dc PF: > { %v819_v16 = vld [vmem:[%s3069_s14] sm:$0xff]  ;;  %v820_v17 = vld [vmem:[%s3069_s14 + $0x8] sm:$0xff]  ;;  %v821_v18 = vld [vmem:[%s3069_s14 + $0x10] sm:$0xff]  ;;  %v2738_v19 = vmov 0.0|0.0   ;;  %vm2739_vm1 = vmmov 0   ;;  %v2740_v22 = vmov 0.0   ;;  %s3420_s25 = scalar_lea.vmem %s3333_s5, %s3055_s3  ;;  %s3421_s0 = scalar_lea.vmem %s3329_s1, %s3052_s2 }
 0x1dd   : > { %2373 = vmatprep.subr.bf16.mxu1 %v2738_v19  ;;  %v2374_v20 = vpack.c.bf16 %v820_v17, %v819_v16  ;;  %v822_v21 = vld [vmem:[%s3069_s14 + $0x18] sm:$0xff]  ;;  %2289 = vmatprep.mubr.msk.f32.mxu1 %vm2739_vm1, %v2740_v22  ;;  %vm830_vm2 = vcmask 261120   ;;  %v2207_v25 = vld [vmem:[%s3420_s25] ss:$0 sm:$0xff]  ;;  %s2741_s28 = smov 96   ;;  %s2742_s19 = smov 120  }
 0x1de   : > { %2302 = vmatprep.subr.mxu0 %v2740_v22  ;;  %2304 = vmatprep.mubr.msk.f32.mxu0 %vm2739_vm1, %v2740_v22  ;;  %v2377_v23 = vpack.c.bf16 %v822_v21, %v821_v18  ;;  %s2743_s9 = smov 88   ;;  %s2744_s17 = smov 80   ;;  %vm914_vm3 = vcmask 64512   ;;  %v2209_v37 = vld [vmem:[%s3421_s0] ss:$0 sm:$0xff]  ;;  %vm1585_vm4 = vcmask 130048  }
 0x1df   : > { %2375 = vmatpush3.bf16.msra.mxu1 %v2374_v20  ;;  %s2745_s14 = smov 112   ;;  %s2746_s18 = smov 72   ;;  %vm1587_vm5 = vcmask 195584   ;;  %vm1830_vm7 = vcmask 523264  }
 0x1e0   : > { %2376 = vmatprep.subr.bf16.mxu1 %v2738_v19  ;;  %s2747_s26 = smov 104   ;;  %s2748_s2 = smov 56  }
 0x1e1   : > { %s2749_s16 = smov 64   ;;  %s2750_s15 = smov 48  }
 0x1e2   : > { %v3132_v24 = vld [vmem:[#allocation2] sm:$0xff]  ;;  %s2751_s4 = smov 40   ;;  %s2752_s13 = smov 8  }
 0x1e3   : > { %2378 = vmatpush3.bf16.msra.mxu1 %v2377_v23  ;;  %s2753_s12 = smov 16   ;;  %s2754_s6 = smov 24  }
 0x1e4   : > { %2292 = vmatprep.subr.mxu1 %v2740_v22  ;;  %s3422_s25 = sld [smem:[#allocation31_spill]]  ;;  %s3426_s27 = sld [smem:[#allocation33_spill]] }
 0x1e5   : > { %p2232_p8 = scmp.ne.s32.totalorder %s2717_s24, 1 }
 0x1e6   : > { %2290 = vmatmul.mubr.msk.f32.vlgmr.msra.gmra.mrb[0].mxu1 %vm830_vm2, %v3132_v24 }
 0x1e7   : > { %2294 = vmatprep.mubr.msk.f32.mxu1 %vm2739_vm1, %v2740_v22 }
 0x2b9   : > { %v900_v26 = vpop.f32.mrb[0].mxu1 }
 0x2ba   : > { %v3144_v27 = vadd.f32 %v2207_v25, %v900_v26  ;;  %v2291_v28 = vpop.f32.mrb[1].mxu1 }
 0x2bc   : > { %912 = vrot.lane.b32.xlu0 %v3144_v27, %s2741_s28  ;;  %v904_v29 = vmul.f32 0.35355338, %v3144_v27  ;;  %s3423_s28 = scalar_lea.vmem %s3422_s25, %s3055_s3 }
 0x2be   : > { %1077 = vrot.lane.b32.xlu1 %v904_v29, %s2742_s19 }
 0x2c0   : > { %1079 = vrot.lane.b32.xlu0 %v3144_v27, %s2743_s9 }
 0x2c2   : > { %1244 = vrot.lane.b32.xlu1 %v3144_v27, %s2744_s17  ;;  %s3424_s17 = sld [smem:[#allocation32_spill]] }
 0x2c4   : > { %1242 = vrot.lane.b32.xlu0 %v904_v29, %s2745_s14 }
 0x2c6   : > { %1409 = vrot.lane.b32.xlu1 %v3144_v27, %s2746_s18 }
 0x2c8   : > { %1407 = vrot.lane.b32.xlu0 %v904_v29, %s2747_s26  ;;  %s3425_s14 = scalar_lea.vmem %s3424_s17, %s3055_s3 }
 0x32e   : > { %v913_v30 = vpop.permute.xlu0 %912 }
 0x32f   : > { %2293 = vmatpush3.xpose.msk.msra.mxu1 %vm914_vm3, %v913_v30  ;;  %v1590_v30 = vld [vmem:[%s3074_s11 + $0x8] sm:$0xff] }
 0x330   : > { %v1078_v31 = vpop.permute.xlu1 %1077  ;;  %2297 = vmatprep.subr.mxu1 %v2740_v22 }
 0x332   : > { %v1080_v32 = vpop.permute.xlu0 %1079  ;;  %2295 = vmatmul.mubr.msk.f32.vlgmr.msra.gmra.mrb[2].mxu1 %vm914_vm3, %v904_v29  ;;  %v1589_v29 = vld [vmem:[%s3074_s11] sm:$0xff] }
 0x333   : > { %2303 = vmatpush3.xpose.msk.msra.mxu0 %vm914_vm3, %v1080_v32  ;;  %2299 = vmatprep.mubr.msk.f32.mxu1 %vm2739_vm1, %v2740_v22 }
 0x334   : > { %v1245_v33 = vpop.permute.xlu1 %1244  ;;  %2312 = vmatprep.subr.mxu0 %v2740_v22 }
 0x336   : > { %2305 = vmatmul.mubr.msk.f32.vlgmr.msra.gmra.mrb[0].mxu0 %vm914_vm3, %v1078_v31  ;;  %v1243_v34 = vpop.permute.xlu0 %1242  ;;  %v2380_v31 = vpack.c.bf16 %v1590_v30, %v1589_v29 }
 0x337   : > { %2313 = vmatpush3.xpose.msk.msra.mxu0 %vm914_vm3, %v1245_v33  ;;  %2314 = vmatprep.mubr.msk.f32.mxu0 %vm2739_vm1, %v2740_v22 }
 0x338   : > { %2322 = vmatprep.subr.mxu0 %v2740_v22  ;;  %v1410_v35 = vpop.permute.xlu1 %1409 }
 0x33a   : > { %2315 = vmatmul.mubr.msk.f32.vlgmr.msra.gmra.mrb[2].mxu0 %vm914_vm3, %v1243_v34  ;;  %v1408_v36 = vpop.permute.xlu0 %1407 }
 0x33b   : > { %2323 = vmatpush3.xpose.msk.msra.mxu0 %vm914_vm3, %v1410_v35  ;;  %2324 = vmatprep.mubr.msk.f32.mxu0 %vm2739_vm1, %v2740_v22 }
 0x33c   : > { %2379 = vmatprep.subr.bf16.mxu0 %v2738_v19 }
 0x33e   : > { %2325 = vmatmul.mubr.msk.f32.vlgmr.msra.gmra.mrb[4].mxu0 %vm914_vm3, %v1408_v36  ;;  %v1591_v36 = vld [vmem:[%s3074_s11 + $0x10] sm:$0xff] }
 0x33f   : > { %2340 = vmatprep.mubr.msk.f32.mxu0 %vm2739_vm1, %v2740_v22  ;;  %2381 = vmatpush3.bf16.msra.mxu0 %v2380_v31 }
 0x340   : > { %2382 = vmatprep.subr.bf16.mxu0 %v2738_v19 }
 0x405   : > { %v986_v38 = vpop.f32.mrb[2].mxu1 }
 0x406   : > { %v987_v39 = vadd.f32 %v2209_v37, %v986_v38  ;;  %v2296_v40 = vpop.f32.mrb[3].mxu1 }
 0x408   : > { %v990_v41 = vsel %vm914_vm3, %v987_v39, -inf }
 0x409   : > { %v1151_v42 = vpop.f32.mrb[0].mxu0  ;;  %991 = vmax.xlane.f32.xlu1 %v990_v41 }
 0x40a   : > { %v1152_v43 = vadd.f32 %v2209_v37, %v1151_v42  ;;  %v2306_v44 = vpop.f32.mrb[1].mxu0 }
 0x40c   : > { %v1155_v45 = vsel %vm914_vm3, %v1152_v43, -inf }
 0x40d   : > { %1156 = vmax.xlane.f32.xlu0 %v1155_v45  ;;  %v1316_v46 = vpop.f32.mrb[2].mxu0 }
 0x40e   : > { %v1317_v47 = vadd.f32 %v2209_v37, %v1316_v46  ;;  %v2316_v48 = vpop.f32.mrb[3].mxu0 }
 0x410   : > { %v1320_v49 = vsel %vm914_vm3, %v1317_v47, -inf }
 0x411   : > { %1321 = vmax.xlane.f32.xlu0 %v1320_v49  ;;  %v1481_v50 = vpop.f32.mrb[4].mxu0  ;;  %v2222_v49 = vld [vmem:[%s3423_s28] ss:$0 sm:$0xff] }
 0x412   : > { %v1482_v51 = vadd.f32 %v2209_v37, %v1481_v50  ;;  %v2326_v52 = vpop.f32.mrb[5].mxu0  ;;  %v1592_v37 = vld [vmem:[%s3074_s11 + $0x18] sm:$0xff] }
 0x413   : > { %v2383_v38 = vpack.c.bf16 %v1592_v37, %v1591_v36 }
 0x414   : > { %v1485_v53 = vsel %vm914_vm3, %v1482_v51, -inf }
 0x415   : > { %1486 = vmax.xlane.f32.xlu1 %v1485_v53  ;;  %2384 = vmatpush3.bf16.msra.mxu0 %v2383_v38 }
 0x416   : > { %2391 = vmatprep.subr.bf16.mxu0 %v2738_v19 }
 0x426   : > { %1166 = vrot.lane.b32.xlu1 %v3144_v27, %s2748_s2 }
 0x496   : > { %v992_v54 = vpop.xlane.xlu1 %991 }
 0x497   : > { %v993_v55 = vsub.f32 %v987_v39, %v992_v54 }
 0x499   : > { %v994_v56 = vmul.f32 1.442695, %v993_v55 }
 0x49a   : > { %v1157_v57 = vpop.xlane.xlu0 %1156 }
 0x49b   : > { %2521 = vpow2.f32 %v994_v56  ;;  %v1158_v58 = vsub.f32 %v1152_v43, %v1157_v57 }
 0x49d   : > { %v1159_v59 = vmul.f32 1.442695, %v1158_v58 }
 0x49e   : > { %v1322_v5 = vpop.xlane.xlu0 %1321 }
 0x49f   : > { %2523 = vpow2.f32 %v1159_v59  ;;  %v1323_v6 = vsub.f32 %v1317_v47, %v1322_v5  ;;  %v1704_v59 = vld [vmem:[%s3091_s30] sm:$0xff] }
 0x4a1   : > { %v1324_v7 = vmul.f32 1.442695, %v1323_v6 }
 0x4a2   : > { %v1487_v60 = vpop.xlane.xlu1 %1486 }
 0x4a3   : > { %v1488_v61 = vsub.f32 %v1482_v51, %v1487_v60  ;;  %v1705_v60 = vld [vmem:[%s3091_s30 + $0x8] sm:$0xff] }
 0x4a5   : > { %v2522_v62 = vpop.eup %2521  ;;  %v1489_v63 = vmul.f32 1.442695, %v1488_v61  ;;  %v2386_v61 = vpack.c.bf16 %v1705_v60, %v1704_v59 }
 0x4a6   : > { %v996_v0 = vsel %vm914_vm3, %v2522_v62, 0.0  ;;  %v1167_v10 = vpop.permute.xlu1 %1166 }
 0x4a7   : > { %2525 = vpow2.f32 %v1489_v63  ;;  %997 = vadd.xlane.f32.xlu0 %v996_v0 }
 0x4a8   : > { %2527 = vpow2.f32 %v1324_v7 }
 0x4a9   : > { %v2524_v1 = vpop.eup %2523 }
 0x4aa   : > { %v1161_v2 = vsel %vm914_vm3, %v2524_v1, 0.0 }
 0x4ab   : > { %1162 = vadd.xlane.f32.xlu1 %v1161_v2 }
 0x4b1   : > { %v2526_v3 = vpop.eup %2525 }
 0x4b2   : > { %v1491_v4 = vsel %vm914_vm3, %v2526_v3, 0.0  ;;  %v2528_v8 = vpop.eup %2527 }
 0x4b3   : > { %1492 = vadd.xlane.f32.xlu1 %v1491_v4  ;;  %v1326_v9 = vsel %vm914_vm3, %v2528_v8, 0.0  ;;  %v2224_v4 = vld [vmem:[%s3425_s14] ss:$0 sm:$0xff] }
 0x4bd   : > { %1001 = vrot.lane.b32.xlu0 %v3144_v27, %s2749_s16 }
 0x4c4   : > { %1331 = vrot.lane.b32.xlu1 %v3144_v27, %s2750_s15 }
 0x4dc   : > { %1327 = vadd.xlane.f32.xlu0 %v1326_v9  ;;  %v1815_v9 = vld [vmem:[%s3101_s7] sm:$0xff] }
 0x4f2   : > { %1496 = vrot.lane.b32.xlu0 %v3144_v27, %s2751_s4 }
 0x534   : > { %v998_v11 = vpop.xlane.xlu0 %997 }
 0x535   : > { %2529 = vrcp.f32 %v998_v11 }
 0x538   : > { %v1002_v12 = vpop.permute.xlu0 %1001  ;;  %v1163_v13 = vpop.xlane.xlu1 %1162 }
 0x539   : > { %2531 = vrcp.f32 %v1163_v13  ;;  %2298 = vmatpush3.msra.mxu1 %v1002_v12  ;;  %v1817_v12 = vld [vmem:[%s3101_s7 + $0x10] sm:$0xff]  ;;  %v1818_v13 = vld [vmem:[%s3101_s7 + $0x18] sm:$0xff] }
 0x53a   : > { %2307 = vmatprep.subr.mxu1 %v2740_v22 }
 0x53f   : > { %v2530_v14 = vpop.eup %2529 }
 0x540   : > { %v1000_v15 = vmul.f32 %v2530_v14, %v2522_v62  ;;  %v1493_v16 = vpop.xlane.xlu1 %1492  ;;  %v1707_v62 = vld [vmem:[%s3091_s30 + $0x18] sm:$0xff]  ;;  %v2395_v14 = vpack.c.bf16 %v1818_v13, %v1817_v12 }
 0x542   : > { %2300 = vmatmul.mubr.msk.f32.vlgmr.msra.gmra.mrb[4].mxu1 %vm914_vm3, %v1000_v15  ;;  %v1819_v15 = vld [vmem:[%s3101_s7 + $0x20] sm:$0xff] }
 0x543   : > { %v2532_v17 = vpop.eup %2531  ;;  %2308 = vmatpush3.msra.mxu1 %v1167_v10  ;;  %2309 = vmatprep.mubr.msk.f32.mxu1 %vm2739_vm1, %v2740_v22  ;;  %v1816_v10 = vld [vmem:[%s3101_s7 + $0x8] sm:$0xff] }
 0x544   : > { %v1165_v18 = vmul.f32 %v2532_v17, %v2524_v1  ;;  %v1332_v20 = vpop.permute.xlu1 %1331  ;;  %2317 = vmatprep.subr.mxu1 %v2740_v22  ;;  %v2392_v11 = vpack.c.bf16 %v1816_v10, %v1815_v9 }
 0x546   : > { %2310 = vmatmul.mubr.msk.f32.vlgmr.msra.gmra.mrb[6].mxu1 %vm914_vm3, %v1165_v18  ;;  %v1821_v18 = vld [vmem:[%s3101_s7 + $0x30] sm:$0xff] }
 0x547   : > { %2318 = vmatpush3.msra.mxu1 %v1332_v20  ;;  %2319 = vmatprep.mubr.msk.f32.mxu1 %vm2739_vm1, %v2740_v22  ;;  %v1822_v20 = vld [vmem:[%s3101_s7 + $0x38] sm:$0xff] }
 0x548   : > { %2327 = vmatprep.subr.mxu1 %v2740_v22 }
 0x569   : > { %v1328_v21 = vpop.xlane.xlu0 %1327 }
 0x56a   : > { %2533 = vrcp.f32 %v1328_v21  ;;  %v2401_v21 = vpack.c.bf16 %v1822_v20, %v1821_v18 }
 0x56b   : > { %2535 = vrcp.f32 %v1493_v16  ;;  %v1820_v16 = vld [vmem:[%s3101_s7 + $0x28] sm:$0xff] }
 0x56c   : > { %v2398_v17 = vpack.c.bf16 %v1820_v16, %v1819_v15 }
 0x56d   : > { %v1497_v27 = vpop.permute.xlu0 %1496 }
 0x574   : > { %v2534_v23 = vpop.eup %2533 }
 0x575   : > { %v1330_v25 = vmul.f32 %v2534_v23, %v2528_v8  ;;  %v2536_v26 = vpop.eup %2535  ;;  %v2226_v23 = vld [vmem:[%s765_s10] ss:$0 sm:$0xff] }
 0x576   : > { %v1495_v28 = vmul.f32 %v2536_v26, %v2526_v3 }
 0x577   : > { %2320 = vmatmul.mubr.msk.f32.vlgmr.msra.gmra.mrb[8].mxu1 %vm914_vm3, %v1330_v25 }
 0x578   : > { %2328 = vmatpush3.msra.mxu1 %v1497_v27  ;;  %2329 = vmatprep.mubr.msk.f32.mxu1 %vm2739_vm1, %v2740_v22 }
 0x579   : > { %2385 = vmatprep.subr.bf16.mxu1 %v2738_v19 }
 0x57b   : > { %2330 = vmatmul.mubr.msk.f32.vlgmr.msra.gmra.mrb[10].mxu1 %vm914_vm3, %v1495_v28 }
 0x57c   : > { %2351 = vmatprep.mubr.msk.f32.mxu1 %vm2739_vm1, %v2740_v22  ;;  %2387 = vmatpush3.bf16.msra.mxu1 %v2386_v61 }
 0x57d   : > { %2388 = vmatprep.subr.bf16.mxu1 %v2738_v19 }
 0x615   : > { %v1073_v32 = vpop.f32.mrb[4].mxu1 }
 0x616   : > { %v2301_v33 = vpop.f32.mrb[5].mxu1 }
 0x619   : > { %v1238_v34 = vpop.f32.mrb[6].mxu1 }
 0x61a   : > { %1573 = vrot.lane.b32.xlu1 %v1238_v34, %s2752_s13  ;;  %v2311_v35 = vpop.f32.mrb[7].mxu1 }
 0x64a   : > { %v1403_v39 = vpop.f32.mrb[8].mxu1 }
 0x64b   : > { %1577 = vrot.lane.b32.xlu0 %v1403_v39, %s2753_s12  ;;  %v2321_v40 = vpop.f32.mrb[9].mxu1 }
 0x64e   : > { %v1568_v41 = vpop.f32.mrb[10].mxu1 }
 0x64f   : > { %1581 = vrot.lane.b32.xlu1 %v1568_v41, %s2754_s6  ;;  %v2331_v42 = vpop.f32.mrb[11].mxu1 }
 0x68c   : > { %v1574_v43 = vpop.permute.xlu1 %1573 }
 0x68d   : > { %v1584_v45 = vsel %vm914_vm3, %v1073_v32, %v1574_v43 }
 0x6bd   : > { %v1578_v44 = vpop.permute.xlu0 %1577 }
 0x6be   : > { %v1586_v46 = vsel %vm1585_vm4, %v1584_v45, %v1578_v44 }
 0x6c1   : > { %v1582_v47 = vpop.permute.xlu1 %1581 }
 0x6c2   : > { %v1588_v48 = vsel %vm1587_vm5, %v1586_v46, %v1582_v47 }
 0x6c3   : > { %2341 = vmatmul.mubr.msk.f32.vlgmr.msra.gmra.mrb[6].mxu0 %vm830_vm2, %v1588_v48 }
 0x6c4   : > { %2370 = vmatprep.mubr.msk.f32.mxu0 %vm2739_vm1, %v2740_v22  ;;  %2393 = vmatpush3.bf16.msra.mxu0 %v2392_v11 }
 0x6c5   : > { %2394 = vmatprep.subr.bf16.mxu0 %v2738_v19 }
 0x6c8   : > { %2396 = vmatpush3.bf16.msra.mxu0 %v2395_v14 }
 0x6c9   : > { %2397 = vmatprep.subr.bf16.mxu0 %v2738_v19 }
 0x6cc   : > { %2399 = vmatpush3.bf16.msra.mxu0 %v2398_v17 }
 0x6cd   : > { %2400 = vmatprep.subr.bf16.mxu0 %v2738_v19 }
 0x6d0   : > { %2402 = vmatpush3.bf16.msra.mxu0 %v2401_v21 }
 0x796   : > { %v1669_v50 = vpop.f32.mrb[6].mxu0 }
 0x797   : > { %v1670_v51 = vadd.f32 %v2222_v49, %v1669_v50  ;;  %v2342_v52 = vpop.f32.mrb[7].mxu0 }
 0x798   : > { %v2228_v52 = vld [vmem:[%s773_s21] ss:$0 sm:$0xff] }
 0x799   : > { %v1673_v53 = vadd.f32 %v1670_v51, %v3132_v24  ;;  %v1706_v24 = vld [vmem:[%s3091_s30 + $0x10] sm:$0xff]  ;;  %s3427_s30 = scalar_lea.vmem %s3426_s27, %s3055_s3 }
 0x79a   : > { %v2389_v63 = vpack.c.bf16 %v1707_v62, %v1706_v24  ;;  %v2225_v6 = vld [vmem:[%s3427_s30] ss:$0 sm:$0xff] }
 0x79b   : > { %v1676_v54 = vsel %vm830_vm2, %v1673_v53, 0.0 }
 0x79c   : > { %1677 = vadd.xlane.f32.xlu0 %v1676_v54  ;;  %2390 = vmatpush3.bf16.msra.mxu1 %v2389_v63 }
 0x829   : > { %v1678_v55 = vpop.xlane.xlu0 %1677 }
 0x82a   : > { %v1680_v56 = vmul.f32 0.03125, %v1678_v55 }
 0x82c   : > { %v1681_v57 = vsub.f32 %v1673_v53, %v1680_v56 }
 0x82e   : > { %v1682_v58 = vmul.f32 %v1681_v57, %v1681_v57 }
 0x830   : > { %v1683_v22 = vsel %vm830_vm2, %v1682_v58, 0.0 }
 0x831   : > { %1684 = vadd.xlane.f32.xlu1 %v1683_v22 }
 0x8be   : > { %v1685_v0 = vpop.xlane.xlu1 %1684 }
 0x8bf   : > { %v1686_v1 = vmul.f32 0.03125, %v1685_v0 }
 0x8c1   : > { %v1687_v2 = vadd.f32 1e-05, %v1686_v1  ;;  %v2230_v1 = vld [vmem:[%s776_s29] ss:$0 sm:$0xff] }
 0x8c3   : > { %2537 = vrsqrt.f32 %v1687_v2 }
 0x8cd   : > { %v2538_v3 = vpop.eup %2537 }
 0x8ce   : > { %v1689_v5 = vmul.f32 %v2538_v3, %v1681_v57  ;;  %v2231_v3 = vld [vmem:[%s779_s8] ss:$0 sm:$0xff] }
 0x8d0   : > { %v1696_v7 = vmul.f32 %v2224_v4, %v1689_v5 }
 0x8d2   : > { %v1703_v8 = vadd.f32 %v2225_v6, %v1696_v7 }
 0x8d4   : > { %2352 = vmatmul.mubr.msk.f32.vlgmr.msra.gmra.mrb[12].mxu1 %vm830_vm2, %v1703_v8 }
 0x9a7   : > { %v1784_v25 = vpop.f32.mrb[12].mxu1 }
 0x9a8   : > { %v1785_v26 = vadd.f32 %v2226_v23, %v1784_v25  ;;  %v2353_v27 = vpop.f32.mrb[13].mxu1 }
 0x9aa   : > { %v1789_v28 = vmul.f32 0.70710677, %v1785_v26  ;;  %v1788_v49 = vmul.f32 0.5, %v1785_v26 }
 0x9ac   : > { %v1790_v29 = vand.u32 2147483647, %v1789_v28  ;;  %vm1810_vm6 = vcmp.lt.f32.partialorder %v1789_v28, 0.0 }
 0x9ae   : > { %v1791_v30 = vmul.f32 0.3275911, %v1790_v29  ;;  %v1804_v32 = vsub.f32 0.0, %v1790_v29 }
 0x9b0   : > { %v1792_v31 = vadd.f32 1.0, %v1791_v30  ;;  %v1805_v19 = vmul.f32 %v1804_v32, %v1790_v29 }
 0x9b2   : > { %2539 = vrcp.f32 %v1792_v31  ;;  %v1806_v36 = vmul.f32 1.442695, %v1805_v19 }
 0x9b4   : > { %2541 = vpow2.f32 %v1806_v36 }
 0x9bc   : > { %v2540_v33 = vpop.eup %2539 }
 0x9bd   : > { %v1795_v34 = vmul.f32 1.0614054, %v2540_v33 }
 0x9be   : > { %v2542_v44 = vpop.eup %2541 }
 0x9bf   : > { %v1796_v35 = vadd.f32 -1.4531521, %v1795_v34 }
 0x9c1   : > { %v1797_v37 = vmul.f32 %v2540_v33, %v1796_v35 }
 0x9c3   : > { %v1798_v38 = vadd.f32 1.4214138, %v1797_v37 }
 0x9c5   : > { %v1799_v39 = vmul.f32 %v2540_v33, %v1798_v38 }
 0x9c7   : > { %v1800_v40 = vadd.f32 -0.28449672, %v1799_v39 }
 0x9c9   : > { %v1801_v41 = vmul.f32 %v2540_v33, %v1800_v40 }
 0x9cb   : > { %v1802_v42 = vadd.f32 0.2548296, %v1801_v41 }
 0x9cd   : > { %v1803_v43 = vmul.f32 %v2540_v33, %v1802_v42 }
 0x9cf   : > { %v1808_v45 = vmul.f32 %v2542_v44, %v1803_v43 }
 0x9d1   : > { %v1809_v46 = vsub.f32 1.0, %v1808_v45 }
 0x9d3   : > { %v1811_v47 = vsub.f32 0.0, %v1809_v46 }
 0x9d5   : > { %v1812_v48 = vsel %vm1810_vm6, %v1811_v47, %v1809_v46 }
 0x9d6   : > { %v1813_v50 = vadd.f32 1.0, %v1812_v48 }
 0x9d8   : > { %v1814_v51 = vmul.f32 %v1813_v50, %v1788_v49 }
 0x9da   : > { %2371 = vmatmul.mubr.msk.f32.vlgmr.msra.gmra.mrb[8].mxu0 %vm1830_vm7, %v1814_v51 }
 0xaad   : > { %v1900_v53 = vpop.f32.mrb[8].mxu0 }
 0xaae   : > { %v1901_v54 = vadd.f32 %v2228_v52, %v1900_v53  ;;  %v2372_v55 = vpop.f32.mrb[9].mxu0 }
 0xab0   : > { %v1904_v56 = vadd.f32 %v1901_v54, %v1703_v8 }
 0xab2   : > { %v1907_v57 = vsel %vm830_vm2, %v1904_v56, 0.0 }
 0xab3   : > { %1908 = vadd.xlane.f32.xlu0 %v1907_v57 }
 0xb40   : > { %v1909_v58 = vpop.xlane.xlu0 %1908 }
 0xb41   : > { %v1910_v22 = vmul.f32 0.03125, %v1909_v58 }
 0xb43   : > { %v1911_v59 = vsub.f32 %v1904_v56, %v1910_v22 }
 0xb45   : > { %v1912_v60 = vmul.f32 %v1911_v59, %v1911_v59 }
 0xb47   : > { %v1913_v61 = vsel %vm830_vm2, %v1912_v60, 0.0 }
 0xb48   : > { %1914 = vadd.xlane.f32.xlu0 %v1913_v61 }
 0xbd5   : > { %v1915_v24 = vpop.xlane.xlu0 %1914 }
 0xbd6   : > { %v1916_v62 = vmul.f32 0.03125, %v1915_v24 }
 0xbd8   : > { %v1917_v63 = vadd.f32 1e-05, %v1916_v62 }
 0xbda   : > { %2543 = vrsqrt.f32 %v1917_v63 }
 0xbe4   : > { %v2544_v0 = vpop.eup %2543 }
 0xbe5   : > { %v1919_v2 = vmul.f32 %v2544_v0, %v1911_v59  ;;  %1938 = sbr.rel (%p2232_p8) target bundleno = 3052 (0xbec), region = 104 }
 0xbe7   : > { %v1926_v4 = vmul.f32 %v2230_v1, %v1919_v2 }
 0xbe9   : > { %v1933_v5 = vadd.f32 %v2231_v3, %v1926_v4 }
 0xbeb   : > { %1934 = vst.msk [vmem:[#allocation2] sm:$0xff] %vm830_vm2, %v1933_v5  ;;  %1939 = vst.msk [vmem:[%s3115_s20] sm:$0xff] (!%p2232_p8), %vm830_vm2, %v1933_v5 }
 0xbec PF: > { %s3432_s11 = sld [smem:[#allocation16_spill]]  ;;  %s3433_s29 = sld [smem:[#allocation25_spill]] }
 0xbed   : > { %s3435_s3 = sld [smem:[#allocation40_spill]]  ;;  %s1954_s9 = sshll.u32 %s3115_s20, 4  ;;  %s1955_s9 = int_to_ptr.vmem [resolvable:$true] %s1954_s9 }
 0xbee   : > { %s2631_s14 = scalar_lea.vmem %s1955_s9, 128  ;;  %s2755_s24 = smov [#allocation9]  }
 0xbef   : > { %p2632_p13 = scmp.ne.s32.totalorder %s1955_s9, %s2631_s14  ;;  %s2635_s18 = sshll.u32 %s2755_s24, 4  ;;  %s2636_s18 = int_to_ptr.vmem [resolvable:$false] %s2635_s18 }
 0xbf0   : > { %s2637_s26 = scalar_lea.vmem %s2636_s18, 256  ;;  %p2638_p12 = scmp.lt.s32.totalorder %s1955_s9, %s2636_s18 }
 0xbf1   : > { %p2633_p3 = pnand %p2632_p13, %p2982_p6  ;;  %p2639_p11 = scmp.lt.s32.totalorder %s2637_s26, %s2631_s14 }
 0xbf2   : > { %s2234_s25 = sshll.u32 %s3432_s11, 7  ;;  %s1941_s17 = scalar_lea.sflag [#allocation5], %s3433_s29 }
 0xbf3   : > { %s3279_s8 = scalar_lea.hbm %s3435_s3, %s2234_s25  ;;  %p2634_p7 = pneg %p2633_p3 }
 0xbf4   : > { %p2640_p1 = por %p2639_p11, %p2638_p12 }
 0xbf6   : > { %p2641_p9 = pnand %p2640_p1, %p2634_p7 }
 0xbf8   : > { %2644 = shalt.err (!%p2641_p9)
}
 0xbf9   : > { %s2645_s20 = scalar_lea.hbm %s3279_s8, 128  ;;  %s2649_s23 = scalar_lea.hbm %s3435_s3, 256 }
 0xbfa   : > { %p2646_p5 = scmp.ne.s32.totalorder %s3279_s8, %s2645_s20  ;;  %p2650_p2 = scmp.lt.u32.totalorder %s3279_s8, %s3435_s3 }
 0xbfb   : > { %p2651_p10 = scmp.lt.u32.totalorder %s2649_s23, %s2645_s20  ;;  %p2653_p13 = scmp.lt.u32.totalorder %s2645_s20, %s3279_s8 }
 0xbfc   : > { %p2647_p4 = pnand %p2646_p5, %p2982_p6 }
 0xbfd   : > { %p2652_p8 = por %p2651_p10, %p2650_p2 }
 0xbfe   : > { %p2648_p0 = pneg %p2647_p4 }
 0xbff   : > { %p2654_p3 = por %p2653_p13, %p2652_p8 }
 0xc01   : > { %p2655_p7 = pnand %p2654_p3, %p2648_p0 }
 0xc03   : > { %2658 = shalt.err (!%p2655_p7)
}
 0xc04   : > { %2413 = dma.vmem_to_hbm [thread:$0]  (%p2982_p6), %s1955_s9, 128, %s3279_s8, %s1941_s17  }
 0xc05 PF: > { %s3436_s7 = sld [smem:[#allocation19_spill]]  ;;  %s3437_s10 = sld [smem:[#allocation13_spill]] }
 0xc06   : > { %s3438_s16 = sld [smem:[#allocation20_spill]] }
 0xc0b   : > { %p2435_p12 = scmp.ge.s32.totalorder %s3436_s7, 2  ;;  %s1966_s21 = sand.u32 1, %s3437_s10  }
 0xc0c   : > { %p3439_p11 = scmp.ne.s32.totalorder %s3438_s16, 0  ;;  %s1967_s15 = scalar_lea.sflag [#allocation5], %s1966_s21 }
 0xc0e   : > { %p2427_p1 = pnand %p2435_p12, %p3439_p11 }
 0xc10   : > { %2700 = dma.done.wait (!%p2427_p1), %s1967_s15, 128  }
 0xc11   : > { %2702 = vsyncadd (!%p2427_p1), %s1967_s15, 4294967168  ;;  %s33_s28 = sadd.s32 1, %s3436_s7   ;;  %s3440_s21 = sld [smem:[#allocation14_spill]] }
 0xc12   : > { %p30_p9 = scmp.ge.s32.totalorder %s33_s28, 6   ;;  %s3441_s22 = sld [smem:[#allocation15_spill]] }
 0xc13   : > { %s3442_s23 = sld [smem:[#allocation24_spill]]  ;;  %s3443_s24 = sld [smem:[#allocation17_spill]] }
 0xc14   : > { %s3444_s25 = sld [smem:[#allocation18_spill]]  ;;  %s3445_s26 = sld [smem:[#allocation21_spill]] }
 0xc15   : > { %s3446_s27 = sld [smem:[#allocation23_spill]]  ;;  %32 = sbr.rel (!%p30_p9) target bundleno = 24 (0x18), region = 184 }
 0xc1c   :  { %1972 = vsyncpa [#allocation4], 1 }
 0xc1d   :  { %1974 = vsyncpa [#allocation4 + $0x1], 1 }
 0xc1e   :  { %1975 = vsyncpa [#allocation7], 1 }
 0xc1f   :  { %1976 = vsyncpa [#allocation5], 1 }
 0xc20   :  { %1978 = vsyncpa [#allocation5 + $0x1], 1 }

</bundles_post_ra>
